<compile_context>
chip_gen: v6e
topology: v6e:2x2x1
jax: 0.10.0
libtpu: 0.0.40
codegen_flags: <defaults>
</compile_context>

<pallas_src>
import functools

import numpy as np

import jax
import jax.numpy as jnp
from jax import lax
from jax.experimental import pallas as pl
from jax.experimental.pallas import tpu as pltpu

_BIG = 1e30  # plain Python float literal; inputs are binary so this acts as +/-inf padding


def _cldice_kernel(margin_ref, gt_ref, out_ref, *, num_iter, img_w):
    """One grid step processes one lane-pack of Gb batch elements.

    margin_ref: (H, Gb*W)  max(fg logits) - bg logit, native float dtype.
    gt_ref:     (H, Gb*W)  binarized ground truth, int8.
    out_ref:    (8, 128)   lane-dense partial sums; sublanes 0..3 hold
                           [sum(spp*gt), sum(spp), sum(skel_true*prob), sum(skel_true)].
    """
    H, half = margin_ref.shape
    WW = 2 * half  # hard-prediction images and GT images side by side along lanes

    # ---- boundary-validity masks (hoisted once; cheap iota compares) ----
    row = lax.broadcasted_iota(jnp.int32, (H, WW), 0)
    col = lax.broadcasted_iota(jnp.int32, (H, WW), 1)
    lcol = col % img_w                 # lane index within each packed W-wide image
    v_up = row >= 1
    v_dn = row < H - 1
    v_lf = lcol >= 1
    v_rt = lcol < img_w - 1

    # 1-pixel shifts as circular XLU rotations; wrapped values are masked out.
    def sh_up(x):  # x[i-1, :]
        return pltpu.roll(x, 1, 0)

    def sh_dn(x):  # x[i+1, :]
        return pltpu.roll(x, H - 1, 0)

    def sh_lf(x):  # x[:, j-1]
        return pltpu.roll(x, 1, 1)

    def sh_rt(x):  # x[:, j+1]
        return pltpu.roll(x, WW - 1, 1)

    def soft_erode(x):
        # min over (3,1) and (1,3) windows (padded with +inf), elementwise min of both.
        up = jnp.where(v_up, sh_up(x), _BIG)
        dn = jnp.where(v_dn, sh_dn(x), _BIG)
        lf = jnp.where(v_lf, sh_lf(x), _BIG)
        rt = jnp.where(v_rt, sh_rt(x), _BIG)
        p1 = jnp.minimum(jnp.minimum(up, x), dn)
        p2 = jnp.minimum(jnp.minimum(lf, x), rt)
        return jnp.minimum(p1, p2)

    def soft_dilate(x):
        # separable 3x3 max-pool, padded with -inf.
        up = jnp.where(v_up, sh_up(x), -_BIG)
        dn = jnp.where(v_dn, sh_dn(x), -_BIG)
        v = jnp.maximum(jnp.maximum(up, x), dn)
        lf = jnp.where(v_lf, sh_lf(v), -_BIG)
        rt = jnp.where(v_rt, sh_rt(v), -_BIG)
        return jnp.maximum(jnp.maximum(lf, v), rt)

    def soft_skel(img):
        # Erode-carry formulation: the eroded image of iteration i is reused as
        # iteration i+1's input, so every step is exactly one erode + one dilate
        # (iter+1 of each total) while staying bit-identical to the reference.
        er = soft_erode(img)
        skel = jnp.maximum(img - soft_dilate(er), 0.0)

        def body(_, carry):
            im, sk = carry
            er_i = soft_erode(im)
            delta = jnp.maximum(im - soft_dilate(er_i), 0.0)
            sk = sk + jnp.maximum(delta - sk * delta, 0.0)
            return er_i, sk

        _, skel = lax.fori_loop(0, num_iter, body, (er, skel), unroll=True)
        return skel

    # ---- probabilities / binarization ----
    m = margin_ref[...].astype(jnp.float32)            # (H, half)
    prob = 1.0 / (1.0 + jnp.exp(-m))                   # softmax([bg, fg])[1] == sigmoid(fg - bg)
    hard = (m > 0.0).astype(jnp.float32)               # exact: prob > 0.5  <=>  margin > 0
    gt = gt_ref[...].astype(jnp.float32)                # already binarized in the wrapper

    # ---- fused soft skeletonization of [hard predictions | ground truths] ----
    stacked = jnp.concatenate([hard, gt], axis=1)       # (H, 2*half), lane-packed
    skel = soft_skel(stacked)
    skel_pred = skel[:, :half]
    skel_true = skel[:, half:]

    # ---- per-pack partial sums written as one lane-dense (8, 128) block ----
    spp = skel_pred * prob
    s0 = jnp.sum(spp * gt)
    s1 = jnp.sum(spp)
    s2 = jnp.sum(skel_true * prob)
    s3 = jnp.sum(skel_true)

    sub = lax.broadcasted_iota(jnp.int32, (8, 128), 0)
    out_ref[...] = jnp.where(sub == 0, s0,
                   jnp.where(sub == 1, s1,
                   jnp.where(sub == 2, s2,
                   jnp.where(sub == 3, s3, 0.0))))


def soft_cldice_loss(y_pred, y_true, *, iter_=10, smooth=1.0):
    """Pallas implementation of SoftclDiceLoss.forward (t_skeletonize_flage=False)."""
    B, C, H, W = y_pred.shape
    assert y_true.shape == (B, 1, H, W)
    assert C >= 2, "need a background channel and at least one foreground channel"

    # Channel reduce + margin in JAX: softmax([bg, max(fg)])[1] == sigmoid(margin).
    margin = jnp.max(y_pred[:, 1:], axis=1) - y_pred[:, 0]          # (B, H, W), native dtype
    gt = (y_true[:, 0] > 0).astype(jnp.int8)                        # (B, H, W), 1 byte / px

    # Lane packing factor: Gb batch elements per grid step; each step's working
    # image is (H, 2*Gb*W) = [hard_0 | ... | hard_{Gb-1} | gt_0 | ... | gt_{Gb-1}].
    if 2 * W >= 128:
        gb = 1
    else:
        gb = max(1, 128 // (2 * W))
    gb = min(gb, B)
    n_packs = -(-B // gb)
    b_pad = n_packs * gb
    if b_pad != B:
        # Exact: zero margin / zero GT => both skeletons are zero => padded slots
        # contribute nothing to any of the four sums.
        margin = jnp.pad(margin, ((0, b_pad - B), (0, 0), (0, 0)))
        gt = jnp.pad(gt, ((0, b_pad - B), (0, 0), (0, 0)))

    half = gb * W
    m_packed = margin.reshape(n_packs, gb, H, W).transpose(0, 2, 1, 3).reshape(n_packs, H, half)
    g_packed = gt.reshape(n_packs, gb, H, W).transpose(0, 2, 1, 3).reshape(n_packs, H, half)

    # Raise the scoped-VMEM budget only when the per-step working set needs it
    # (default scoped limit: 16 MiB v5e / 32 MiB v6e,v7x).  Rough upper bound:
    # ~16 live (H, 2*half) f32 temporaries + double-buffered inputs + output.
    est_bytes = (16 * H * (2 * half) * 4
                 + 2 * H * half * (margin.dtype.itemsize + 1)
                 + 2 * 8 * 128 * 4)
    params = {"dimension_semantics": ("parallel",)}
    if est_bytes > 24 * 1024 * 1024:
        params["vmem_limit_bytes"] = int(min(64 * 1024 * 1024, est_bytes + 8 * 1024 * 1024))

    partial = pl.pallas_call(
        functools.partial(_cldice_kernel, num_iter=iter_, img_w=W),
        out_shape=jax.ShapeDtypeStruct((n_packs, 8, 128), jnp.float32),
        grid=(n_packs,),
        in_specs=[
            pl.BlockSpec((None, H, half), lambda p: (p, 0, 0)),
            pl.BlockSpec((None, H, half), lambda p: (p, 0, 0)),
        ],
        out_specs=pl.BlockSpec((None, 8, 128), lambda p: (p, 0, 0)),
        compiler_params=pltpu.CompilerParams(**params),
    )(m_packed, g_packed)

    sums = jnp.sum(partial[:, :4, 0], axis=0)                       # (4,)
    tprec = (sums[0] + smooth) / (sums[1] + smooth)
    tsens = (sums[2] + smooth) / (sums[3] + smooth)
    return -2.0 * (tprec * tsens) / (tprec + tsens)


# ----------------------------- pure-JAX reference -----------------------------
def _ref_soft_skel(x, num_iter):  # x: (B, H, W)
    inf = jnp.float32(jnp.inf)

    def erode(v):
        p1 = lax.reduce_window(v, inf, lax.min, (1, 3, 1), (1, 1, 1),
                               [(0, 0), (1, 1), (0, 0)])
        p2 = lax.reduce_window(v, inf, lax.min, (1, 1, 3), (1, 1, 1),
                               [(0, 0), (0, 0), (1, 1)])
        return jnp.minimum(p1, p2)

    def dilate(v):
        return lax.reduce_window(v, -inf, lax.max, (1, 3, 3), (1, 1, 1),
                                 [(0, 0), (1, 1), (1, 1)])

    skel = jax.nn.relu(x - dilate(erode(x)))
    for _ in range(num_iter):
        x = erode(x)
        delta = jax.nn.relu(x - dilate(erode(x)))
        skel = skel + jax.nn.relu(delta - skel * delta)
    return skel


def _reference_loss(y_pred, y_true, iter_=10, smooth=1.0):
    fore = jnp.max(y_pred[:, 1:], axis=1, keepdims=True)
    bin_logits = jnp.concatenate([y_pred[:, :1], fore], axis=1)
    prob = jax.nn.softmax(bin_logits, axis=1)[:, 1]
    yt = jnp.where(y_true > 0, 1.0, 0.0).astype(jnp.float32)[:, 0]
    hard = (prob > 0.5).astype(jnp.float32)
    sp = _ref_soft_skel(hard, iter_)
    st = _ref_soft_skel(yt, iter_)
    spp = sp * prob
    tprec = (jnp.sum(spp * yt) + smooth) / (jnp.sum(spp) + smooth)
    tsens = (jnp.sum(st * prob) + smooth) / (jnp.sum(st) + smooth)
    return -2.0 * (tprec * tsens) / (tprec + tsens)


if __name__ == "__main__":
    B, C, H, W = 2, 4, 16, 16
    key = jax.random.PRNGKey(0)
    kp, kt = jax.random.split(key)
    y_pred = 2.0 * jax.random.normal(kp, (B, C, H, W), dtype=jnp.float32)
    y_true = (jax.random.uniform(kt, (B, 1, H, W)) > 0.6).astype(jnp.float32)

    loss = jax.block_until_ready(soft_cldice_loss(y_pred, y_true, iter_=10, smooth=1.0))
    ref = jax.block_until_ready(_reference_loss(y_pred, y_true, iter_=10, smooth=1.0))
    np.testing.assert_allclose(np.asarray(loss), np.asarray(ref), rtol=2e-3, atol=2e-3)

    print("KERNEL_OK")
</pallas_src>

<mosaic_0001>
module attributes {stable_mosaic.version = 11 : i64} {
  func.func @_cldice_kernel(%arg0: i32, %arg1: memref<1x16x32xf32, #tpu.memory_space<vmem>>, %arg2: memref<1x16x32xi8, #tpu.memory_space<vmem>>, %arg3: memref<1x8x128xf32, #tpu.memory_space<vmem>>) attributes {dimension_semantics = [#tpu.dimension_semantics<parallel>], iteration_bounds = array<i64: 1>, scalar_prefetch = 0 : i64, scratch_operands = 0 : i64, tpu.core_type = #tpu.core_type<tc>, window_params = [{transform_indices = @transform_0, window_bounds = array<i64: 1, 16, 32>}, {transform_indices = @transform_1, window_bounds = array<i64: 1, 16, 32>}, {transform_indices = @transform_2, window_bounds = array<i64: 1, 8, 128>}]} {
    %0 = tpu.iota {dimensions = array<i32: 0>} : vector<16x64xi32>
    %1 = tpu.iota {dimensions = array<i32: 1>} : vector<16x64xi32>
    %c16_i32 = arith.constant 16 : i32
    %c0_i32 = arith.constant 0 : i32
    %2 = arith.cmpi eq, %c16_i32, %c0_i32 : i32
    %c1_i32 = arith.constant 1 : i32
    %3 = arith.select %2, %c1_i32, %c16_i32 : i32
    %4 = vector.broadcast %3 : i32 to vector<16x64xi32>
    %5 = arith.remsi %1, %4 : vector<16x64xi32>
    %c0_i32_0 = arith.constant 0 : i32
    %6 = vector.broadcast %c0_i32_0 : i32 to vector<16x64xi32>
    %7 = arith.cmpi ne, %5, %6 : vector<16x64xi32>
    %c0_i32_1 = arith.constant 0 : i32
    %8 = vector.broadcast %c0_i32_1 : i32 to vector<16x64xi32>
    %9 = arith.cmpi slt, %5, %8 : vector<16x64xi32>
    %c0_i32_2 = arith.constant 0 : i32
    %10 = arith.cmpi slt, %3, %c0_i32_2 : i32
    %11 = vector.broadcast %10 : i1 to vector<16x64xi1>
    %12 = vector.broadcast %11 : vector<16x64xi1> to vector<16x64xi1>
    %13 = arith.xori %9, %12 : vector<16x64xi1>
    %14 = arith.andi %13, %7 : vector<16x64xi1>
    %15 = vector.broadcast %3 : i32 to vector<16x64xi32>
    %16 = arith.addi %5, %15 : vector<16x64xi32>
    %17 = arith.select %14, %16, %5 : vector<16x64xi1>, vector<16x64xi32>
    %c1_i32_3 = arith.constant 1 : i32
    %18 = vector.broadcast %c1_i32_3 : i32 to vector<16x64xi32>
    %19 = arith.cmpi sge, %0, %18 : vector<16x64xi32>
    %c15_i32 = arith.constant 15 : i32
    %20 = vector.broadcast %c15_i32 : i32 to vector<16x64xi32>
    %21 = arith.cmpi slt, %0, %20 : vector<16x64xi32>
    %c1_i32_4 = arith.constant 1 : i32
    %22 = vector.broadcast %c1_i32_4 : i32 to vector<16x64xi32>
    %23 = arith.cmpi sge, %17, %22 : vector<16x64xi32>
    %c15_i32_5 = arith.constant 15 : i32
    %24 = vector.broadcast %c15_i32_5 : i32 to vector<16x64xi32>
    %25 = arith.cmpi slt, %17, %24 : vector<16x64xi32>
    %c0 = arith.constant 0 : index
    %c0_6 = arith.constant 0 : index
    %c0_7 = arith.constant 0 : index
    %26 = vector.load %arg1[%c0, %c0_6, %c0_7] : memref<1x16x32xf32, #tpu.memory_space<vmem>>, vector<1x16x32xf32>
    %27 = vector.shape_cast %26 : vector<1x16x32xf32> to vector<16x32xf32>
    %cst = arith.constant 0.000000e+00 : f32
    %28 = vector.broadcast %cst : f32 to vector<16x32xf32>
    %29 = arith.subf %28, %27 : vector<16x32xf32>
    %30 = math.exp %29 : vector<16x32xf32>
    %cst_8 = arith.constant 1.000000e+00 : f32
    %31 = vector.broadcast %cst_8 : f32 to vector<16x32xf32>
    %32 = arith.addf %31, %30 : vector<16x32xf32>
    %cst_9 = arith.constant 1.000000e+00 : f32
    %33 = vector.broadcast %cst_9 : f32 to vector<16x32xf32>
    %34 = arith.divf %33, %32 : vector<16x32xf32>
    %cst_10 = arith.constant 0.000000e+00 : f32
    %35 = vector.broadcast %cst_10 : f32 to vector<16x32xf32>
    %36 = arith.cmpf ogt, %27, %35 : vector<16x32xf32>
    %37 = arith.extui %36 : vector<16x32xi1> to vector<16x32xi32>
    %38 = arith.sitofp %37 : vector<16x32xi32> to vector<16x32xf32>
    %c0_11 = arith.constant 0 : index
    %c0_12 = arith.constant 0 : index
    %c0_13 = arith.constant 0 : index
    %39 = vector.load %arg2[%c0_11, %c0_12, %c0_13] : memref<1x16x32xi8, #tpu.memory_space<vmem>>, vector<1x16x32xi8>
    %40 = vector.shape_cast %39 : vector<1x16x32xi8> to vector<16x32xi8>
    %41 = arith.sitofp %40 : vector<16x32xi8> to vector<16x32xf32>
    %42 = tpu.concatenate %38, %41 in 1 : vector<16x32xf32>, vector<16x32xf32> -> vector<16x64xf32>
    %c1_i32_14 = arith.constant 1 : i32
    %43 = tpu.dynamic_rotate %42 by %c1_i32_14 dim 0 : vector<16x64xf32>, i32 -> vector<16x64xf32>
    %cst_15 = arith.constant 1.000000e+30 : f32
    %44 = vector.broadcast %cst_15 : f32 to vector<16x64xf32>
    %45 = arith.select %19, %43, %44 : vector<16x64xi1>, vector<16x64xf32>
    %c15_i32_16 = arith.constant 15 : i32
    %46 = tpu.dynamic_rotate %42 by %c15_i32_16 dim 0 : vector<16x64xf32>, i32 -> vector<16x64xf32>
    %cst_17 = arith.constant 1.000000e+30 : f32
    %47 = vector.broadcast %cst_17 : f32 to vector<16x64xf32>
    %48 = arith.select %21, %46, %47 : vector<16x64xi1>, vector<16x64xf32>
    %c1_i32_18 = arith.constant 1 : i32
    %49 = tpu.dynamic_rotate %42 by %c1_i32_18 dim 1 : vector<16x64xf32>, i32 -> vector<16x64xf32>
    %cst_19 = arith.constant 1.000000e+30 : f32
    %50 = vector.broadcast %cst_19 : f32 to vector<16x64xf32>
    %51 = arith.select %23, %49, %50 : vector<16x64xi1>, vector<16x64xf32>
    %c63_i32 = arith.constant 63 : i32
    %52 = tpu.dynamic_rotate %42 by %c63_i32 dim 1 : vector<16x64xf32>, i32 -> vector<16x64xf32>
    %cst_20 = arith.constant 1.000000e+30 : f32
    %53 = vector.broadcast %cst_20 : f32 to vector<16x64xf32>
    %54 = arith.select %25, %52, %53 : vector<16x64xi1>, vector<16x64xf32>
    %55 = arith.minimumf %45, %42 : vector<16x64xf32>
    %56 = arith.minimumf %55, %48 : vector<16x64xf32>
    %57 = arith.minimumf %51, %42 : vector<16x64xf32>
    %58 = arith.minimumf %57, %54 : vector<16x64xf32>
    %59 = arith.minimumf %56, %58 : vector<16x64xf32>
    %c1_i32_21 = arith.constant 1 : i32
    %60 = tpu.dynamic_rotate %59 by %c1_i32_21 dim 0 : vector<16x64xf32>, i32 -> vector<16x64xf32>
    %cst_22 = arith.constant -1.000000e+30 : f32
    %61 = vector.broadcast %cst_22 : f32 to vector<16x64xf32>
    %62 = arith.select %19, %60, %61 : vector<16x64xi1>, vector<16x64xf32>
    %c15_i32_23 = arith.constant 15 : i32
    %63 = tpu.dynamic_rotate %59 by %c15_i32_23 dim 0 : vector<16x64xf32>, i32 -> vector<16x64xf32>
    %cst_24 = arith.constant -1.000000e+30 : f32
    %64 = vector.broadcast %cst_24 : f32 to vector<16x64xf32>
    %65 = arith.select %21, %63, %64 : vector<16x64xi1>, vector<16x64xf32>
    %66 = arith.maximumf %62, %59 : vector<16x64xf32>
    %67 = arith.maximumf %66, %65 : vector<16x64xf32>
    %c1_i32_25 = arith.constant 1 : i32
    %68 = tpu.dynamic_rotate %67 by %c1_i32_25 dim 1 : vector<16x64xf32>, i32 -> vector<16x64xf32>
    %cst_26 = arith.constant -1.000000e+30 : f32
    %69 = vector.broadcast %cst_26 : f32 to vector<16x64xf32>
    %70 = arith.select %23, %68, %69 : vector<16x64xi1>, vector<16x64xf32>
    %c63_i32_27 = arith.constant 63 : i32
    %71 = tpu.dynamic_rotate %67 by %c63_i32_27 dim 1 : vector<16x64xf32>, i32 -> vector<16x64xf32>
    %cst_28 = arith.constant -1.000000e+30 : f32
    %72 = vector.broadcast %cst_28 : f32 to vector<16x64xf32>
    %73 = arith.select %25, %71, %72 : vector<16x64xi1>, vector<16x64xf32>
    %74 = arith.maximumf %70, %67 : vector<16x64xf32>
    %75 = arith.maximumf %74, %73 : vector<16x64xf32>
    %76 = arith.subf %42, %75 : vector<16x64xf32>
    %cst_29 = arith.constant 0.000000e+00 : f32
    %77 = vector.broadcast %cst_29 : f32 to vector<16x64xf32>
    %78 = arith.maximumf %76, %77 : vector<16x64xf32>
    %c0_i32_30 = arith.constant 0 : i32
    %c1_i32_31 = arith.constant 1 : i32
    %79 = tpu.dynamic_rotate %59 by %c1_i32_31 dim 0 : vector<16x64xf32>, i32 -> vector<16x64xf32>
    %cst_32 = arith.constant 1.000000e+30 : f32
    %80 = vector.broadcast %cst_32 : f32 to vector<16x64xf32>
    %81 = arith.select %19, %79, %80 : vector<16x64xi1>, vector<16x64xf32>
    %c15_i32_33 = arith.constant 15 : i32
    %82 = tpu.dynamic_rotate %59 by %c15_i32_33 dim 0 : vector<16x64xf32>, i32 -> vector<16x64xf32>
    %cst_34 = arith.constant 1.000000e+30 : f32
    %83 = vector.broadcast %cst_34 : f32 to vector<16x64xf32>
    %84 = arith.select %21, %82, %83 : vector<16x64xi1>, vector<16x64xf32>
    %c1_i32_35 = arith.constant 1 : i32
    %85 = tpu.dynamic_rotate %59 by %c1_i32_35 dim 1 : vector<16x64xf32>, i32 -> vector<16x64xf32>
    %cst_36 = arith.constant 1.000000e+30 : f32
    %86 = vector.broadcast %cst_36 : f32 to vector<16x64xf32>
    %87 = arith.select %23, %85, %86 : vector<16x64xi1>, vector<16x64xf32>
    %c63_i32_37 = arith.constant 63 : i32
    %88 = tpu.dynamic_rotate %59 by %c63_i32_37 dim 1 : vector<16x64xf32>, i32 -> vector<16x64xf32>
    %cst_38 = arith.constant 1.000000e+30 : f32
    %89 = vector.broadcast %cst_38 : f32 to vector<16x64xf32>
    %90 = arith.select %25, %88, %89 : vector<16x64xi1>, vector<16x64xf32>
    %91 = arith.minimumf %81, %59 : vector<16x64xf32>
    %92 = arith.minimumf %91, %84 : vector<16x64xf32>
    %93 = arith.minimumf %87, %59 : vector<16x64xf32>
    %94 = arith.minimumf %93, %90 : vector<16x64xf32>
    %95 = arith.minimumf %92, %94 : vector<16x64xf32>
    %c1_i32_39 = arith.constant 1 : i32
    %96 = tpu.dynamic_rotate %95 by %c1_i32_39 dim 0 : vector<16x64xf32>, i32 -> vector<16x64xf32>
    %cst_40 = arith.constant -1.000000e+30 : f32
    %97 = vector.broadcast %cst_40 : f32 to vector<16x64xf32>
    %98 = arith.select %19, %96, %97 : vector<16x64xi1>, vector<16x64xf32>
    %c15_i32_41 = arith.constant 15 : i32
    %99 = tpu.dynamic_rotate %95 by %c15_i32_41 dim 0 : vector<16x64xf32>, i32 -> vector<16x64xf32>
    %cst_42 = arith.constant -1.000000e+30 : f32
    %100 = vector.broadcast %cst_42 : f32 to vector<16x64xf32>
    %101 = arith.select %21, %99, %100 : vector<16x64xi1>, vector<16x64xf32>
    %102 = arith.maximumf %98, %95 : vector<16x64xf32>
    %103 = arith.maximumf %102, %101 : vector<16x64xf32>
    %c1_i32_43 = arith.constant 1 : i32
    %104 = tpu.dynamic_rotate %103 by %c1_i32_43 dim 1 : vector<16x64xf32>, i32 -> vector<16x64xf32>
    %cst_44 = arith.constant -1.000000e+30 : f32
    %105 = vector.broadcast %cst_44 : f32 to vector<16x64xf32>
    %106 = arith.select %23, %104, %105 : vector<16x64xi1>, vector<16x64xf32>
    %c63_i32_45 = arith.constant 63 : i32
    %107 = tpu.dynamic_rotate %103 by %c63_i32_45 dim 1 : vector<16x64xf32>, i32 -> vector<16x64xf32>
    %cst_46 = arith.constant -1.000000e+30 : f32
    %108 = vector.broadcast %cst_46 : f32 to vector<16x64xf32>
    %109 = arith.select %25, %107, %108 : vector<16x64xi1>, vector<16x64xf32>
    %110 = arith.maximumf %106, %103 : vector<16x64xf32>
    %111 = arith.maximumf %110, %109 : vector<16x64xf32>
    %112 = arith.subf %59, %111 : vector<16x64xf32>
    %cst_47 = arith.constant 0.000000e+00 : f32
    %113 = vector.broadcast %cst_47 : f32 to vector<16x64xf32>
    %114 = arith.maximumf %112, %113 : vector<16x64xf32>
    %115 = arith.mulf %78, %114 : vector<16x64xf32>
    %116 = arith.subf %114, %115 : vector<16x64xf32>
    %cst_48 = arith.constant 0.000000e+00 : f32
    %117 = vector.broadcast %cst_48 : f32 to vector<16x64xf32>
    %118 = arith.maximumf %116, %117 : vector<16x64xf32>
    %119 = arith.addf %78, %118 : vector<16x64xf32>
    %c1_i32_49 = arith.constant 1 : i32
    %c1_i32_50 = arith.constant 1 : i32
    %120 = tpu.dynamic_rotate %95 by %c1_i32_50 dim 0 : vector<16x64xf32>, i32 -> vector<16x64xf32>
    %cst_51 = arith.constant 1.000000e+30 : f32
    %121 = vector.broadcast %cst_51 : f32 to vector<16x64xf32>
    %122 = arith.select %19, %120, %121 : vector<16x64xi1>, vector<16x64xf32>
    %c15_i32_52 = arith.constant 15 : i32
    %123 = tpu.dynamic_rotate %95 by %c15_i32_52 dim 0 : vector<16x64xf32>, i32 -> vector<16x64xf32>
    %cst_53 = arith.constant 1.000000e+30 : f32
    %124 = vector.broadcast %cst_53 : f32 to vector<16x64xf32>
    %125 = arith.select %21, %123, %124 : vector<16x64xi1>, vector<16x64xf32>
    %c1_i32_54 = arith.constant 1 : i32
    %126 = tpu.dynamic_rotate %95 by %c1_i32_54 dim 1 : vector<16x64xf32>, i32 -> vector<16x64xf32>
    %cst_55 = arith.constant 1.000000e+30 : f32
    %127 = vector.broadcast %cst_55 : f32 to vector<16x64xf32>
    %128 = arith.select %23, %126, %127 : vector<16x64xi1>, vector<16x64xf32>
    %c63_i32_56 = arith.constant 63 : i32
    %129 = tpu.dynamic_rotate %95 by %c63_i32_56 dim 1 : vector<16x64xf32>, i32 -> vector<16x64xf32>
    %cst_57 = arith.constant 1.000000e+30 : f32
    %130 = vector.broadcast %cst_57 : f32 to vector<16x64xf32>
    %131 = arith.select %25, %129, %130 : vector<16x64xi1>, vector<16x64xf32>
    %132 = arith.minimumf %122, %95 : vector<16x64xf32>
    %133 = arith.minimumf %132, %125 : vector<16x64xf32>
    %134 = arith.minimumf %128, %95 : vector<16x64xf32>
    %135 = arith.minimumf %134, %131 : vector<16x64xf32>
    %136 = arith.minimumf %133, %135 : vector<16x64xf32>
    %c1_i32_58 = arith.constant 1 : i32
    %137 = tpu.dynamic_rotate %136 by %c1_i32_58 dim 0 : vector<16x64xf32>, i32 -> vector<16x64xf32>
    %cst_59 = arith.constant -1.000000e+30 : f32
    %138 = vector.broadcast %cst_59 : f32 to vector<16x64xf32>
    %139 = arith.select %19, %137, %138 : vector<16x64xi1>, vector<16x64xf32>
    %c15_i32_60 = arith.constant 15 : i32
    %140 = tpu.dynamic_rotate %136 by %c15_i32_60 dim 0 : vector<16x64xf32>, i32 -> vector<16x64xf32>
    %cst_61 = arith.constant -1.000000e+30 : f32
    %141 = vector.broadcast %cst_61 : f32 to vector<16x64xf32>
    %142 = arith.select %21, %140, %141 : vector<16x64xi1>, vector<16x64xf32>
    %143 = arith.maximumf %139, %136 : vector<16x64xf32>
    %144 = arith.maximumf %143, %142 : vector<16x64xf32>
    %c1_i32_62 = arith.constant 1 : i32
    %145 = tpu.dynamic_rotate %144 by %c1_i32_62 dim 1 : vector<16x64xf32>, i32 -> vector<16x64xf32>
    %cst_63 = arith.constant -1.000000e+30 : f32
    %146 = vector.broadcast %cst_63 : f32 to vector<16x64xf32>
    %147 = arith.select %23, %145, %146 : vector<16x64xi1>, vector<16x64xf32>
    %c63_i32_64 = arith.constant 63 : i32
    %148 = tpu.dynamic_rotate %144 by %c63_i32_64 dim 1 : vector<16x64xf32>, i32 -> vector<16x64xf32>
    %cst_65 = arith.constant -1.000000e+30 : f32
    %149 = vector.broadcast %cst_65 : f32 to vector<16x64xf32>
    %150 = arith.select %25, %148, %149 : vector<16x64xi1>, vector<16x64xf32>
    %151 = arith.maximumf %147, %144 : vector<16x64xf32>
    %152 = arith.maximumf %151, %150 : vector<16x64xf32>
    %153 = arith.subf %95, %152 : vector<16x64xf32>
    %cst_66 = arith.constant 0.000000e+00 : f32
    %154 = vector.broadcast %cst_66 : f32 to vector<16x64xf32>
    %155 = arith.maximumf %153, %154 : vector<16x64xf32>
    %156 = arith.mulf %119, %155 : vector<16x64xf32>
    %157 = arith.subf %155, %156 : vector<16x64xf32>
    %cst_67 = arith.constant 0.000000e+00 : f32
    %158 = vector.broadcast %cst_67 : f32 to vector<16x64xf32>
    %159 = arith.maximumf %157, %158 : vector<16x64xf32>
    %160 = arith.addf %119, %159 : vector<16x64xf32>
    %c2_i32 = arith.constant 2 : i32
    %c1_i32_68 = arith.constant 1 : i32
    %161 = tpu.dynamic_rotate %136 by %c1_i32_68 dim 0 : vector<16x64xf32>, i32 -> vector<16x64xf32>
    %cst_69 = arith.constant 1.000000e+30 : f32
    %162 = vector.broadcast %cst_69 : f32 to vector<16x64xf32>
    %163 = arith.select %19, %161, %162 : vector<16x64xi1>, vector<16x64xf32>
    %c15_i32_70 = arith.constant 15 : i32
    %164 = tpu.dynamic_rotate %136 by %c15_i32_70 dim 0 : vector<16x64xf32>, i32 -> vector<16x64xf32>
    %cst_71 = arith.constant 1.000000e+30 : f32
    %165 = vector.broadcast %cst_71 : f32 to vector<16x64xf32>
    %166 = arith.select %21, %164, %165 : vector<16x64xi1>, vector<16x64xf32>
    %c1_i32_72 = arith.constant 1 : i32
    %167 = tpu.dynamic_rotate %136 by %c1_i32_72 dim 1 : vector<16x64xf32>, i32 -> vector<16x64xf32>
    %cst_73 = arith.constant 1.000000e+30 : f32
    %168 = vector.broadcast %cst_73 : f32 to vector<16x64xf32>
    %169 = arith.select %23, %167, %168 : vector<16x64xi1>, vector<16x64xf32>
    %c63_i32_74 = arith.constant 63 : i32
    %170 = tpu.dynamic_rotate %136 by %c63_i32_74 dim 1 : vector<16x64xf32>, i32 -> vector<16x64xf32>
    %cst_75 = arith.constant 1.000000e+30 : f32
    %171 = vector.broadcast %cst_75 : f32 to vector<16x64xf32>
    %172 = arith.select %25, %170, %171 : vector<16x64xi1>, vector<16x64xf32>
    %173 = arith.minimumf %163, %136 : vector<16x64xf32>
    %174 = arith.minimumf %173, %166 : vector<16x64xf32>
    %175 = arith.minimumf %169, %136 : vector<16x64xf32>
    %176 = arith.minimumf %175, %172 : vector<16x64xf32>
    %177 = arith.minimumf %174, %176 : vector<16x64xf32>
    %c1_i32_76 = arith.constant 1 : i32
    %178 = tpu.dynamic_rotate %177 by %c1_i32_76 dim 0 : vector<16x64xf32>, i32 -> vector<16x64xf32>
    %cst_77 = arith.constant -1.000000e+30 : f32
    %179 = vector.broadcast %cst_77 : f32 to vector<16x64xf32>
    %180 = arith.select %19, %178, %179 : vector<16x64xi1>, vector<16x64xf32>
    %c15_i32_78 = arith.constant 15 : i32
    %181 = tpu.dynamic_rotate %177 by %c15_i32_78 dim 0 : vector<16x64xf32>, i32 -> vector<16x64xf32>
    %cst_79 = arith.constant -1.000000e+30 : f32
    %182 = vector.broadcast %cst_79 : f32 to vector<16x64xf32>
    %183 = arith.select %21, %181, %182 : vector<16x64xi1>, vector<16x64xf32>
    %184 = arith.maximumf %180, %177 : vector<16x64xf32>
    %185 = arith.maximumf %184, %183 : vector<16x64xf32>
    %c1_i32_80 = arith.constant 1 : i32
    %186 = tpu.dynamic_rotate %185 by %c1_i32_80 dim 1 : vector<16x64xf32>, i32 -> vector<16x64xf32>
    %cst_81 = arith.constant -1.000000e+30 : f32
    %187 = vector.broadcast %cst_81 : f32 to vector<16x64xf32>
    %188 = arith.select %23, %186, %187 : vector<16x64xi1>, vector<16x64xf32>
    %c63_i32_82 = arith.constant 63 : i32
    %189 = tpu.dynamic_rotate %185 by %c63_i32_82 dim 1 : vector<16x64xf32>, i32 -> vector<16x64xf32>
    %cst_83 = arith.constant -1.000000e+30 : f32
    %190 = vector.broadcast %cst_83 : f32 to vector<16x64xf32>
    %191 = arith.select %25, %189, %190 : vector<16x64xi1>, vector<16x64xf32>
    %192 = arith.maximumf %188, %185 : vector<16x64xf32>
    %193 = arith.maximumf %192, %191 : vector<16x64xf32>
    %194 = arith.subf %136, %193 : vector<16x64xf32>
    %cst_84 = arith.constant 0.000000e+00 : f32
    %195 = vector.broadcast %cst_84 : f32 to vector<16x64xf32>
    %196 = arith.maximumf %194, %195 : vector<16x64xf32>
    %197 = arith.mulf %160, %196 : vector<16x64xf32>
    %198 = arith.subf %196, %197 : vector<16x64xf32>
    %cst_85 = arith.constant 0.000000e+00 : f32
    %199 = vector.broadcast %cst_85 : f32 to vector<16x64xf32>
    %200 = arith.maximumf %198, %199 : vector<16x64xf32>
    %201 = arith.addf %160, %200 : vector<16x64xf32>
    %c3_i32 = arith.constant 3 : i32
    %c1_i32_86 = arith.constant 1 : i32
    %202 = tpu.dynamic_rotate %177 by %c1_i32_86 dim 0 : vector<16x64xf32>, i32 -> vector<16x64xf32>
    %cst_87 = arith.constant 1.000000e+30 : f32
    %203 = vector.broadcast %cst_87 : f32 to vector<16x64xf32>
    %204 = arith.select %19, %202, %203 : vector<16x64xi1>, vector<16x64xf32>
    %c15_i32_88 = arith.constant 15 : i32
    %205 = tpu.dynamic_rotate %177 by %c15_i32_88 dim 0 : vector<16x64xf32>, i32 -> vector<16x64xf32>
    %cst_89 = arith.constant 1.000000e+30 : f32
    %206 = vector.broadcast %cst_89 : f32 to vector<16x64xf32>
    %207 = arith.select %21, %205, %206 : vector<16x64xi1>, vector<16x64xf32>
    %c1_i32_90 = arith.constant 1 : i32
    %208 = tpu.dynamic_rotate %177 by %c1_i32_90 dim 1 : vector<16x64xf32>, i32 -> vector<16x64xf32>
    %cst_91 = arith.constant 1.000000e+30 : f32
    %209 = vector.broadcast %cst_91 : f32 to vector<16x64xf32>
    %210 = arith.select %23, %208, %209 : vector<16x64xi1>, vector<16x64xf32>
    %c63_i32_92 = arith.constant 63 : i32
    %211 = tpu.dynamic_rotate %177 by %c63_i32_92 dim 1 : vector<16x64xf32>, i32 -> vector<16x64xf32>
    %cst_93 = arith.constant 1.000000e+30 : f32
    %212 = vector.broadcast %cst_93 : f32 to vector<16x64xf32>
    %213 = arith.select %25, %211, %212 : vector<16x64xi1>, vector<16x64xf32>
    %214 = arith.minimumf %204, %177 : vector<16x64xf32>
    %215 = arith.minimumf %214, %207 : vector<16x64xf32>
    %216 = arith.minimumf %210, %177 : vector<16x64xf32>
    %217 = arith.minimumf %216, %213 : vector<16x64xf32>
    %218 = arith.minimumf %215, %217 : vector<16x64xf32>
    %c1_i32_94 = arith.constant 1 : i32
    %219 = tpu.dynamic_rotate %218 by %c1_i32_94 dim 0 : vector<16x64xf32>, i32 -> vector<16x64xf32>
    %cst_95 = arith.constant -1.000000e+30 : f32
    %220 = vector.broadcast %cst_95 : f32 to vector<16x64xf32>
    %221 = arith.select %19, %219, %220 : vector<16x64xi1>, vector<16x64xf32>
    %c15_i32_96 = arith.constant 15 : i32
    %222 = tpu.dynamic_rotate %218 by %c15_i32_96 dim 0 : vector<16x64xf32>, i32 -> vector<16x64xf32>
    %cst_97 = arith.constant -1.000000e+30 : f32
    %223 = vector.broadcast %cst_97 : f32 to vector<16x64xf32>
    %224 = arith.select %21, %222, %223 : vector<16x64xi1>, vector<16x64xf32>
    %225 = arith.maximumf %221, %218 : vector<16x64xf32>
    %226 = arith.maximumf %225, %224 : vector<16x64xf32>
    %c1_i32_98 = arith.constant 1 : i32
    %227 = tpu.dynamic_rotate %226 by %c1_i32_98 dim 1 : vector<16x64xf32>, i32 -> vector<16x64xf32>
    %cst_99 = arith.constant -1.000000e+30 : f32
    %228 = vector.broadcast %cst_99 : f32 to vector<16x64xf32>
    %229 = arith.select %23, %227, %228 : vector<16x64xi1>, vector<16x64xf32>
    %c63_i32_100 = arith.constant 63 : i32
    %230 = tpu.dynamic_rotate %226 by %c63_i32_100 dim 1 : vector<16x64xf32>, i32 -> vector<16x64xf32>
    %cst_101 = arith.constant -1.000000e+30 : f32
    %231 = vector.broadcast %cst_101 : f32 to vector<16x64xf32>
    %232 = arith.select %25, %230, %231 : vector<16x64xi1>, vector<16x64xf32>
    %233 = arith.maximumf %229, %226 : vector<16x64xf32>
    %234 = arith.maximumf %233, %232 : vector<16x64xf32>
    %235 = arith.subf %177, %234 : vector<16x64xf32>
    %cst_102 = arith.constant 0.000000e+00 : f32
    %236 = vector.broadcast %cst_102 : f32 to vector<16x64xf32>
    %237 = arith.maximumf %235, %236 : vector<16x64xf32>
    %238 = arith.mulf %201, %237 : vector<16x64xf32>
    %239 = arith.subf %237, %238 : vector<16x64xf32>
    %cst_103 = arith.constant 0.000000e+00 : f32
    %240 = vector.broadcast %cst_103 : f32 to vector<16x64xf32>
    %241 = arith.maximumf %239, %240 : vector<16x64xf32>
    %242 = arith.addf %201, %241 : vector<16x64xf32>
    %c4_i32 = arith.constant 4 : i32
    %c1_i32_104 = arith.constant 1 : i32
    %243 = tpu.dynamic_rotate %218 by %c1_i32_104 dim 0 : vector<16x64xf32>, i32 -> vector<16x64xf32>
    %cst_105 = arith.constant 1.000000e+30 : f32
    %244 = vector.broadcast %cst_105 : f32 to vector<16x64xf32>
    %245 = arith.select %19, %243, %244 : vector<16x64xi1>, vector<16x64xf32>
    %c15_i32_106 = arith.constant 15 : i32
    %246 = tpu.dynamic_rotate %218 by %c15_i32_106 dim 0 : vector<16x64xf32>, i32 -> vector<16x64xf32>
    %cst_107 = arith.constant 1.000000e+30 : f32
    %247 = vector.broadcast %cst_107 : f32 to vector<16x64xf32>
    %248 = arith.select %21, %246, %247 : vector<16x64xi1>, vector<16x64xf32>
    %c1_i32_108 = arith.constant 1 : i32
    %249 = tpu.dynamic_rotate %218 by %c1_i32_108 dim 1 : vector<16x64xf32>, i32 -> vector<16x64xf32>
    %cst_109 = arith.constant 1.000000e+30 : f32
    %250 = vector.broadcast %cst_109 : f32 to vector<16x64xf32>
    %251 = arith.select %23, %249, %250 : vector<16x64xi1>, vector<16x64xf32>
    %c63_i32_110 = arith.constant 63 : i32
    %252 = tpu.dynamic_rotate %218 by %c63_i32_110 dim 1 : vector<16x64xf32>, i32 -> vector<16x64xf32>
    %cst_111 = arith.constant 1.000000e+30 : f32
    %253 = vector.broadcast %cst_111 : f32 to vector<16x64xf32>
    %254 = arith.select %25, %252, %253 : vector<16x64xi1>, vector<16x64xf32>
    %255 = arith.minimumf %245, %218 : vector<16x64xf32>
    %256 = arith.minimumf %255, %248 : vector<16x64xf32>
    %257 = arith.minimumf %251, %218 : vector<16x64xf32>
    %258 = arith.minimumf %257, %254 : vector<16x64xf32>
    %259 = arith.minimumf %256, %258 : vector<16x64xf32>
    %c1_i32_112 = arith.constant 1 : i32
    %260 = tpu.dynamic_rotate %259 by %c1_i32_112 dim 0 : vector<16x64xf32>, i32 -> vector<16x64xf32>
    %cst_113 = arith.constant -1.000000e+30 : f32
    %261 = vector.broadcast %cst_113 : f32 to vector<16x64xf32>
    %262 = arith.select %19, %260, %261 : vector<16x64xi1>, vector<16x64xf32>
    %c15_i32_114 = arith.constant 15 : i32
    %263 = tpu.dynamic_rotate %259 by %c15_i32_114 dim 0 : vector<16x64xf32>, i32 -> vector<16x64xf32>
    %cst_115 = arith.constant -1.000000e+30 : f32
    %264 = vector.broadcast %cst_115 : f32 to vector<16x64xf32>
    %265 = arith.select %21, %263, %264 : vector<16x64xi1>, vector<16x64xf32>
    %266 = arith.maximumf %262, %259 : vector<16x64xf32>
    %267 = arith.maximumf %266, %265 : vector<16x64xf32>
    %c1_i32_116 = arith.constant 1 : i32
    %268 = tpu.dynamic_rotate %267 by %c1_i32_116 dim 1 : vector<16x64xf32>, i32 -> vector<16x64xf32>
    %cst_117 = arith.constant -1.000000e+30 : f32
    %269 = vector.broadcast %cst_117 : f32 to vector<16x64xf32>
    %270 = arith.select %23, %268, %269 : vector<16x64xi1>, vector<16x64xf32>
    %c63_i32_118 = arith.constant 63 : i32
    %271 = tpu.dynamic_rotate %267 by %c63_i32_118 dim 1 : vector<16x64xf32>, i32 -> vector<16x64xf32>
    %cst_119 = arith.constant -1.000000e+30 : f32
    %272 = vector.broadcast %cst_119 : f32 to vector<16x64xf32>
    %273 = arith.select %25, %271, %272 : vector<16x64xi1>, vector<16x64xf32>
    %274 = arith.maximumf %270, %267 : vector<16x64xf32>
    %275 = arith.maximumf %274, %273 : vector<16x64xf32>
    %276 = arith.subf %218, %275 : vector<16x64xf32>
    %cst_120 = arith.constant 0.000000e+00 : f32
    %277 = vector.broadcast %cst_120 : f32 to vector<16x64xf32>
    %278 = arith.maximumf %276, %277 : vector<16x64xf32>
    %279 = arith.mulf %242, %278 : vector<16x64xf32>
    %280 = arith.subf %278, %279 : vector<16x64xf32>
    %cst_121 = arith.constant 0.000000e+00 : f32
    %281 = vector.broadcast %cst_121 : f32 to vector<16x64xf32>
    %282 = arith.maximumf %280, %281 : vector<16x64xf32>
    %283 = arith.addf %242, %282 : vector<16x64xf32>
    %c5_i32 = arith.constant 5 : i32
    %c1_i32_122 = arith.constant 1 : i32
    %284 = tpu.dynamic_rotate %259 by %c1_i32_122 dim 0 : vector<16x64xf32>, i32 -> vector<16x64xf32>
    %cst_123 = arith.constant 1.000000e+30 : f32
    %285 = vector.broadcast %cst_123 : f32 to vector<16x64xf32>
    %286 = arith.select %19, %284, %285 : vector<16x64xi1>, vector<16x64xf32>
    %c15_i32_124 = arith.constant 15 : i32
    %287 = tpu.dynamic_rotate %259 by %c15_i32_124 dim 0 : vector<16x64xf32>, i32 -> vector<16x64xf32>
    %cst_125 = arith.constant 1.000000e+30 : f32
    %288 = vector.broadcast %cst_125 : f32 to vector<16x64xf32>
    %289 = arith.select %21, %287, %288 : vector<16x64xi1>, vector<16x64xf32>
    %c1_i32_126 = arith.constant 1 : i32
    %290 = tpu.dynamic_rotate %259 by %c1_i32_126 dim 1 : vector<16x64xf32>, i32 -> vector<16x64xf32>
    %cst_127 = arith.constant 1.000000e+30 : f32
    %291 = vector.broadcast %cst_127 : f32 to vector<16x64xf32>
    %292 = arith.select %23, %290, %291 : vector<16x64xi1>, vector<16x64xf32>
    %c63_i32_128 = arith.constant 63 : i32
    %293 = tpu.dynamic_rotate %259 by %c63_i32_128 dim 1 : vector<16x64xf32>, i32 -> vector<16x64xf32>
    %cst_129 = arith.constant 1.000000e+30 : f32
    %294 = vector.broadcast %cst_129 : f32 to vector<16x64xf32>
    %295 = arith.select %25, %293, %294 : vector<16x64xi1>, vector<16x64xf32>
    %296 = arith.minimumf %286, %259 : vector<16x64xf32>
    %297 = arith.minimumf %296, %289 : vector<16x64xf32>
    %298 = arith.minimumf %292, %259 : vector<16x64xf32>
    %299 = arith.minimumf %298, %295 : vector<16x64xf32>
    %300 = arith.minimumf %297, %299 : vector<16x64xf32>
    %c1_i32_130 = arith.constant 1 : i32
    %301 = tpu.dynamic_rotate %300 by %c1_i32_130 dim 0 : vector<16x64xf32>, i32 -> vector<16x64xf32>
    %cst_131 = arith.constant -1.000000e+30 : f32
    %302 = vector.broadcast %cst_131 : f32 to vector<16x64xf32>
    %303 = arith.select %19, %301, %302 : vector<16x64xi1>, vector<16x64xf32>
    %c15_i32_132 = arith.constant 15 : i32
    %304 = tpu.dynamic_rotate %300 by %c15_i32_132 dim 0 : vector<16x64xf32>, i32 -> vector<16x64xf32>
    %cst_133 = arith.constant -1.000000e+30 : f32
    %305 = vector.broadcast %cst_133 : f32 to vector<16x64xf32>
    %306 = arith.select %21, %304, %305 : vector<16x64xi1>, vector<16x64xf32>
    %307 = arith.maximumf %303, %300 : vector<16x64xf32>
    %308 = arith.maximumf %307, %306 : vector<16x64xf32>
    %c1_i32_134 = arith.constant 1 : i32
    %309 = tpu.dynamic_rotate %308 by %c1_i32_134 dim 1 : vector<16x64xf32>, i32 -> vector<16x64xf32>
    %cst_135 = arith.constant -1.000000e+30 : f32
    %310 = vector.broadcast %cst_135 : f32 to vector<16x64xf32>
    %311 = arith.select %23, %309, %310 : vector<16x64xi1>, vector<16x64xf32>
    %c63_i32_136 = arith.constant 63 : i32
    %312 = tpu.dynamic_rotate %308 by %c63_i32_136 dim 1 : vector<16x64xf32>, i32 -> vector<16x64xf32>
    %cst_137 = arith.constant -1.000000e+30 : f32
    %313 = vector.broadcast %cst_137 : f32 to vector<16x64xf32>
    %314 = arith.select %25, %312, %313 : vector<16x64xi1>, vector<16x64xf32>
    %315 = arith.maximumf %311, %308 : vector<16x64xf32>
    %316 = arith.maximumf %315, %314 : vector<16x64xf32>
    %317 = arith.subf %259, %316 : vector<16x64xf32>
    %cst_138 = arith.constant 0.000000e+00 : f32
    %318 = vector.broadcast %cst_138 : f32 to vector<16x64xf32>
    %319 = arith.maximumf %317, %318 : vector<16x64xf32>
    %320 = arith.mulf %283, %319 : vector<16x64xf32>
    %321 = arith.subf %319, %320 : vector<16x64xf32>
    %cst_139 = arith.constant 0.000000e+00 : f32
    %322 = vector.broadcast %cst_139 : f32 to vector<16x64xf32>
    %323 = arith.maximumf %321, %322 : vector<16x64xf32>
    %324 = arith.addf %283, %323 : vector<16x64xf32>
    %c6_i32 = arith.constant 6 : i32
    %c1_i32_140 = arith.constant 1 : i32
    %325 = tpu.dynamic_rotate %300 by %c1_i32_140 dim 0 : vector<16x64xf32>, i32 -> vector<16x64xf32>
    %cst_141 = arith.constant 1.000000e+30 : f32
    %326 = vector.broadcast %cst_141 : f32 to vector<16x64xf32>
    %327 = arith.select %19, %325, %326 : vector<16x64xi1>, vector<16x64xf32>
    %c15_i32_142 = arith.constant 15 : i32
    %328 = tpu.dynamic_rotate %300 by %c15_i32_142 dim 0 : vector<16x64xf32>, i32 -> vector<16x64xf32>
    %cst_143 = arith.constant 1.000000e+30 : f32
    %329 = vector.broadcast %cst_143 : f32 to vector<16x64xf32>
    %330 = arith.select %21, %328, %329 : vector<16x64xi1>, vector<16x64xf32>
    %c1_i32_144 = arith.constant 1 : i32
    %331 = tpu.dynamic_rotate %300 by %c1_i32_144 dim 1 : vector<16x64xf32>, i32 -> vector<16x64xf32>
    %cst_145 = arith.constant 1.000000e+30 : f32
    %332 = vector.broadcast %cst_145 : f32 to vector<16x64xf32>
    %333 = arith.select %23, %331, %332 : vector<16x64xi1>, vector<16x64xf32>
    %c63_i32_146 = arith.constant 63 : i32
    %334 = tpu.dynamic_rotate %300 by %c63_i32_146 dim 1 : vector<16x64xf32>, i32 -> vector<16x64xf32>
    %cst_147 = arith.constant 1.000000e+30 : f32
    %335 = vector.broadcast %cst_147 : f32 to vector<16x64xf32>
    %336 = arith.select %25, %334, %335 : vector<16x64xi1>, vector<16x64xf32>
    %337 = arith.minimumf %327, %300 : vector<16x64xf32>
    %338 = arith.minimumf %337, %330 : vector<16x64xf32>
    %339 = arith.minimumf %333, %300 : vector<16x64xf32>
    %340 = arith.minimumf %339, %336 : vector<16x64xf32>
    %341 = arith.minimumf %338, %340 : vector<16x64xf32>
    %c1_i32_148 = arith.constant 1 : i32
    %342 = tpu.dynamic_rotate %341 by %c1_i32_148 dim 0 : vector<16x64xf32>, i32 -> vector<16x64xf32>
    %cst_149 = arith.constant -1.000000e+30 : f32
    %343 = vector.broadcast %cst_149 : f32 to vector<16x64xf32>
    %344 = arith.select %19, %342, %343 : vector<16x64xi1>, vector<16x64xf32>
    %c15_i32_150 = arith.constant 15 : i32
    %345 = tpu.dynamic_rotate %341 by %c15_i32_150 dim 0 : vector<16x64xf32>, i32 -> vector<16x64xf32>
    %cst_151 = arith.constant -1.000000e+30 : f32
    %346 = vector.broadcast %cst_151 : f32 to vector<16x64xf32>
    %347 = arith.select %21, %345, %346 : vector<16x64xi1>, vector<16x64xf32>
    %348 = arith.maximumf %344, %341 : vector<16x64xf32>
    %349 = arith.maximumf %348, %347 : vector<16x64xf32>
    %c1_i32_152 = arith.constant 1 : i32
    %350 = tpu.dynamic_rotate %349 by %c1_i32_152 dim 1 : vector<16x64xf32>, i32 -> vector<16x64xf32>
    %cst_153 = arith.constant -1.000000e+30 : f32
    %351 = vector.broadcast %cst_153 : f32 to vector<16x64xf32>
    %352 = arith.select %23, %350, %351 : vector<16x64xi1>, vector<16x64xf32>
    %c63_i32_154 = arith.constant 63 : i32
    %353 = tpu.dynamic_rotate %349 by %c63_i32_154 dim 1 : vector<16x64xf32>, i32 -> vector<16x64xf32>
    %cst_155 = arith.constant -1.000000e+30 : f32
    %354 = vector.broadcast %cst_155 : f32 to vector<16x64xf32>
    %355 = arith.select %25, %353, %354 : vector<16x64xi1>, vector<16x64xf32>
    %356 = arith.maximumf %352, %349 : vector<16x64xf32>
    %357 = arith.maximumf %356, %355 : vector<16x64xf32>
    %358 = arith.subf %300, %357 : vector<16x64xf32>
    %cst_156 = arith.constant 0.000000e+00 : f32
    %359 = vector.broadcast %cst_156 : f32 to vector<16x64xf32>
    %360 = arith.maximumf %358, %359 : vector<16x64xf32>
    %361 = arith.mulf %324, %360 : vector<16x64xf32>
    %362 = arith.subf %360, %361 : vector<16x64xf32>
    %cst_157 = arith.constant 0.000000e+00 : f32
    %363 = vector.broadcast %cst_157 : f32 to vector<16x64xf32>
    %364 = arith.maximumf %362, %363 : vector<16x64xf32>
    %365 = arith.addf %324, %364 : vector<16x64xf32>
    %c7_i32 = arith.constant 7 : i32
    %c1_i32_158 = arith.constant 1 : i32
    %366 = tpu.dynamic_rotate %341 by %c1_i32_158 dim 0 : vector<16x64xf32>, i32 -> vector<16x64xf32>
    %cst_159 = arith.constant 1.000000e+30 : f32
    %367 = vector.broadcast %cst_159 : f32 to vector<16x64xf32>
    %368 = arith.select %19, %366, %367 : vector<16x64xi1>, vector<16x64xf32>
    %c15_i32_160 = arith.constant 15 : i32
    %369 = tpu.dynamic_rotate %341 by %c15_i32_160 dim 0 : vector<16x64xf32>, i32 -> vector<16x64xf32>
    %cst_161 = arith.constant 1.000000e+30 : f32
    %370 = vector.broadcast %cst_161 : f32 to vector<16x64xf32>
    %371 = arith.select %21, %369, %370 : vector<16x64xi1>, vector<16x64xf32>
    %c1_i32_162 = arith.constant 1 : i32
    %372 = tpu.dynamic_rotate %341 by %c1_i32_162 dim 1 : vector<16x64xf32>, i32 -> vector<16x64xf32>
    %cst_163 = arith.constant 1.000000e+30 : f32
    %373 = vector.broadcast %cst_163 : f32 to vector<16x64xf32>
    %374 = arith.select %23, %372, %373 : vector<16x64xi1>, vector<16x64xf32>
    %c63_i32_164 = arith.constant 63 : i32
    %375 = tpu.dynamic_rotate %341 by %c63_i32_164 dim 1 : vector<16x64xf32>, i32 -> vector<16x64xf32>
    %cst_165 = arith.constant 1.000000e+30 : f32
    %376 = vector.broadcast %cst_165 : f32 to vector<16x64xf32>
    %377 = arith.select %25, %375, %376 : vector<16x64xi1>, vector<16x64xf32>
    %378 = arith.minimumf %368, %341 : vector<16x64xf32>
    %379 = arith.minimumf %378, %371 : vector<16x64xf32>
    %380 = arith.minimumf %374, %341 : vector<16x64xf32>
    %381 = arith.minimumf %380, %377 : vector<16x64xf32>
    %382 = arith.minimumf %379, %381 : vector<16x64xf32>
    %c1_i32_166 = arith.constant 1 : i32
    %383 = tpu.dynamic_rotate %382 by %c1_i32_166 dim 0 : vector<16x64xf32>, i32 -> vector<16x64xf32>
    %cst_167 = arith.constant -1.000000e+30 : f32
    %384 = vector.broadcast %cst_167 : f32 to vector<16x64xf32>
    %385 = arith.select %19, %383, %384 : vector<16x64xi1>, vector<16x64xf32>
    %c15_i32_168 = arith.constant 15 : i32
    %386 = tpu.dynamic_rotate %382 by %c15_i32_168 dim 0 : vector<16x64xf32>, i32 -> vector<16x64xf32>
    %cst_169 = arith.constant -1.000000e+30 : f32
    %387 = vector.broadcast %cst_169 : f32 to vector<16x64xf32>
    %388 = arith.select %21, %386, %387 : vector<16x64xi1>, vector<16x64xf32>
    %389 = arith.maximumf %385, %382 : vector<16x64xf32>
    %390 = arith.maximumf %389, %388 : vector<16x64xf32>
    %c1_i32_170 = arith.constant 1 : i32
    %391 = tpu.dynamic_rotate %390 by %c1_i32_170 dim 1 : vector<16x64xf32>, i32 -> vector<16x64xf32>
    %cst_171 = arith.constant -1.000000e+30 : f32
    %392 = vector.broadcast %cst_171 : f32 to vector<16x64xf32>
    %393 = arith.select %23, %391, %392 : vector<16x64xi1>, vector<16x64xf32>
    %c63_i32_172 = arith.constant 63 : i32
    %394 = tpu.dynamic_rotate %390 by %c63_i32_172 dim 1 : vector<16x64xf32>, i32 -> vector<16x64xf32>
    %cst_173 = arith.constant -1.000000e+30 : f32
    %395 = vector.broadcast %cst_173 : f32 to vector<16x64xf32>
    %396 = arith.select %25, %394, %395 : vector<16x64xi1>, vector<16x64xf32>
    %397 = arith.maximumf %393, %390 : vector<16x64xf32>
    %398 = arith.maximumf %397, %396 : vector<16x64xf32>
    %399 = arith.subf %341, %398 : vector<16x64xf32>
    %cst_174 = arith.constant 0.000000e+00 : f32
    %400 = vector.broadcast %cst_174 : f32 to vector<16x64xf32>
    %401 = arith.maximumf %399, %400 : vector<16x64xf32>
    %402 = arith.mulf %365, %401 : vector<16x64xf32>
    %403 = arith.subf %401, %402 : vector<16x64xf32>
    %cst_175 = arith.constant 0.000000e+00 : f32
    %404 = vector.broadcast %cst_175 : f32 to vector<16x64xf32>
    %405 = arith.maximumf %403, %404 : vector<16x64xf32>
    %406 = arith.addf %365, %405 : vector<16x64xf32>
    %c8_i32 = arith.constant 8 : i32
    %c1_i32_176 = arith.constant 1 : i32
    %407 = tpu.dynamic_rotate %382 by %c1_i32_176 dim 0 : vector<16x64xf32>, i32 -> vector<16x64xf32>
    %cst_177 = arith.constant 1.000000e+30 : f32
    %408 = vector.broadcast %cst_177 : f32 to vector<16x64xf32>
    %409 = arith.select %19, %407, %408 : vector<16x64xi1>, vector<16x64xf32>
    %c15_i32_178 = arith.constant 15 : i32
    %410 = tpu.dynamic_rotate %382 by %c15_i32_178 dim 0 : vector<16x64xf32>, i32 -> vector<16x64xf32>
    %cst_179 = arith.constant 1.000000e+30 : f32
    %411 = vector.broadcast %cst_179 : f32 to vector<16x64xf32>
    %412 = arith.select %21, %410, %411 : vector<16x64xi1>, vector<16x64xf32>
    %c1_i32_180 = arith.constant 1 : i32
    %413 = tpu.dynamic_rotate %382 by %c1_i32_180 dim 1 : vector<16x64xf32>, i32 -> vector<16x64xf32>
    %cst_181 = arith.constant 1.000000e+30 : f32
    %414 = vector.broadcast %cst_181 : f32 to vector<16x64xf32>
    %415 = arith.select %23, %413, %414 : vector<16x64xi1>, vector<16x64xf32>
    %c63_i32_182 = arith.constant 63 : i32
    %416 = tpu.dynamic_rotate %382 by %c63_i32_182 dim 1 : vector<16x64xf32>, i32 -> vector<16x64xf32>
    %cst_183 = arith.constant 1.000000e+30 : f32
    %417 = vector.broadcast %cst_183 : f32 to vector<16x64xf32>
    %418 = arith.select %25, %416, %417 : vector<16x64xi1>, vector<16x64xf32>
    %419 = arith.minimumf %409, %382 : vector<16x64xf32>
    %420 = arith.minimumf %419, %412 : vector<16x64xf32>
    %421 = arith.minimumf %415, %382 : vector<16x64xf32>
    %422 = arith.minimumf %421, %418 : vector<16x64xf32>
    %423 = arith.minimumf %420, %422 : vector<16x64xf32>
    %c1_i32_184 = arith.constant 1 : i32
    %424 = tpu.dynamic_rotate %423 by %c1_i32_184 dim 0 : vector<16x64xf32>, i32 -> vector<16x64xf32>
    %cst_185 = arith.constant -1.000000e+30 : f32
    %425 = vector.broadcast %cst_185 : f32 to vector<16x64xf32>
    %426 = arith.select %19, %424, %425 : vector<16x64xi1>, vector<16x64xf32>
    %c15_i32_186 = arith.constant 15 : i32
    %427 = tpu.dynamic_rotate %423 by %c15_i32_186 dim 0 : vector<16x64xf32>, i32 -> vector<16x64xf32>
    %cst_187 = arith.constant -1.000000e+30 : f32
    %428 = vector.broadcast %cst_187 : f32 to vector<16x64xf32>
    %429 = arith.select %21, %427, %428 : vector<16x64xi1>, vector<16x64xf32>
    %430 = arith.maximumf %426, %423 : vector<16x64xf32>
    %431 = arith.maximumf %430, %429 : vector<16x64xf32>
    %c1_i32_188 = arith.constant 1 : i32
    %432 = tpu.dynamic_rotate %431 by %c1_i32_188 dim 1 : vector<16x64xf32>, i32 -> vector<16x64xf32>
    %cst_189 = arith.constant -1.000000e+30 : f32
    %433 = vector.broadcast %cst_189 : f32 to vector<16x64xf32>
    %434 = arith.select %23, %432, %433 : vector<16x64xi1>, vector<16x64xf32>
    %c63_i32_190 = arith.constant 63 : i32
    %435 = tpu.dynamic_rotate %431 by %c63_i32_190 dim 1 : vector<16x64xf32>, i32 -> vector<16x64xf32>
    %cst_191 = arith.constant -1.000000e+30 : f32
    %436 = vector.broadcast %cst_191 : f32 to vector<16x64xf32>
    %437 = arith.select %25, %435, %436 : vector<16x64xi1>, vector<16x64xf32>
    %438 = arith.maximumf %434, %431 : vector<16x64xf32>
    %439 = arith.maximumf %438, %437 : vector<16x64xf32>
    %440 = arith.subf %382, %439 : vector<16x64xf32>
    %cst_192 = arith.constant 0.000000e+00 : f32
    %441 = vector.broadcast %cst_192 : f32 to vector<16x64xf32>
    %442 = arith.maximumf %440, %441 : vector<16x64xf32>
    %443 = arith.mulf %406, %442 : vector<16x64xf32>
    %444 = arith.subf %442, %443 : vector<16x64xf32>
    %cst_193 = arith.constant 0.000000e+00 : f32
    %445 = vector.broadcast %cst_193 : f32 to vector<16x64xf32>
    %446 = arith.maximumf %444, %445 : vector<16x64xf32>
    %447 = arith.addf %406, %446 : vector<16x64xf32>
    %c9_i32 = arith.constant 9 : i32
    %c1_i32_194 = arith.constant 1 : i32
    %448 = tpu.dynamic_rotate %423 by %c1_i32_194 dim 0 : vector<16x64xf32>, i32 -> vector<16x64xf32>
    %cst_195 = arith.constant 1.000000e+30 : f32
    %449 = vector.broadcast %cst_195 : f32 to vector<16x64xf32>
    %450 = arith.select %19, %448, %449 : vector<16x64xi1>, vector<16x64xf32>
    %c15_i32_196 = arith.constant 15 : i32
    %451 = tpu.dynamic_rotate %423 by %c15_i32_196 dim 0 : vector<16x64xf32>, i32 -> vector<16x64xf32>
    %cst_197 = arith.constant 1.000000e+30 : f32
    %452 = vector.broadcast %cst_197 : f32 to vector<16x64xf32>
    %453 = arith.select %21, %451, %452 : vector<16x64xi1>, vector<16x64xf32>
    %c1_i32_198 = arith.constant 1 : i32
    %454 = tpu.dynamic_rotate %423 by %c1_i32_198 dim 1 : vector<16x64xf32>, i32 -> vector<16x64xf32>
    %cst_199 = arith.constant 1.000000e+30 : f32
    %455 = vector.broadcast %cst_199 : f32 to vector<16x64xf32>
    %456 = arith.select %23, %454, %455 : vector<16x64xi1>, vector<16x64xf32>
    %c63_i32_200 = arith.constant 63 : i32
    %457 = tpu.dynamic_rotate %423 by %c63_i32_200 dim 1 : vector<16x64xf32>, i32 -> vector<16x64xf32>
    %cst_201 = arith.constant 1.000000e+30 : f32
    %458 = vector.broadcast %cst_201 : f32 to vector<16x64xf32>
    %459 = arith.select %25, %457, %458 : vector<16x64xi1>, vector<16x64xf32>
    %460 = arith.minimumf %450, %423 : vector<16x64xf32>
    %461 = arith.minimumf %460, %453 : vector<16x64xf32>
    %462 = arith.minimumf %456, %423 : vector<16x64xf32>
    %463 = arith.minimumf %462, %459 : vector<16x64xf32>
    %464 = arith.minimumf %461, %463 : vector<16x64xf32>
    %c1_i32_202 = arith.constant 1 : i32
    %465 = tpu.dynamic_rotate %464 by %c1_i32_202 dim 0 : vector<16x64xf32>, i32 -> vector<16x64xf32>
    %cst_203 = arith.constant -1.000000e+30 : f32
    %466 = vector.broadcast %cst_203 : f32 to vector<16x64xf32>
    %467 = arith.select %19, %465, %466 : vector<16x64xi1>, vector<16x64xf32>
    %c15_i32_204 = arith.constant 15 : i32
    %468 = tpu.dynamic_rotate %464 by %c15_i32_204 dim 0 : vector<16x64xf32>, i32 -> vector<16x64xf32>
    %cst_205 = arith.constant -1.000000e+30 : f32
    %469 = vector.broadcast %cst_205 : f32 to vector<16x64xf32>
    %470 = arith.select %21, %468, %469 : vector<16x64xi1>, vector<16x64xf32>
    %471 = arith.maximumf %467, %464 : vector<16x64xf32>
    %472 = arith.maximumf %471, %470 : vector<16x64xf32>
    %c1_i32_206 = arith.constant 1 : i32
    %473 = tpu.dynamic_rotate %472 by %c1_i32_206 dim 1 : vector<16x64xf32>, i32 -> vector<16x64xf32>
    %cst_207 = arith.constant -1.000000e+30 : f32
    %474 = vector.broadcast %cst_207 : f32 to vector<16x64xf32>
    %475 = arith.select %23, %473, %474 : vector<16x64xi1>, vector<16x64xf32>
    %c63_i32_208 = arith.constant 63 : i32
    %476 = tpu.dynamic_rotate %472 by %c63_i32_208 dim 1 : vector<16x64xf32>, i32 -> vector<16x64xf32>
    %cst_209 = arith.constant -1.000000e+30 : f32
    %477 = vector.broadcast %cst_209 : f32 to vector<16x64xf32>
    %478 = arith.select %25, %476, %477 : vector<16x64xi1>, vector<16x64xf32>
    %479 = arith.maximumf %475, %472 : vector<16x64xf32>
    %480 = arith.maximumf %479, %478 : vector<16x64xf32>
    %481 = arith.subf %423, %480 : vector<16x64xf32>
    %cst_210 = arith.constant 0.000000e+00 : f32
    %482 = vector.broadcast %cst_210 : f32 to vector<16x64xf32>
    %483 = arith.maximumf %481, %482 : vector<16x64xf32>
    %484 = arith.mulf %447, %483 : vector<16x64xf32>
    %485 = arith.subf %483, %484 : vector<16x64xf32>
    %cst_211 = arith.constant 0.000000e+00 : f32
    %486 = vector.broadcast %cst_211 : f32 to vector<16x64xf32>
    %487 = arith.maximumf %485, %486 : vector<16x64xf32>
    %488 = arith.addf %447, %487 : vector<16x64xf32>
    %489 = vector.extract_strided_slice %488 {offsets = [0, 0], sizes = [16, 32], strides = [1, 1]} : vector<16x64xf32> to vector<16x32xf32>
    %490 = vector.extract_strided_slice %488 {offsets = [0, 32], sizes = [16, 32], strides = [1, 1]} : vector<16x64xf32> to vector<16x32xf32>
    %491 = arith.mulf %489, %34 : vector<16x32xf32>
    %492 = arith.mulf %491, %41 : vector<16x32xf32>
    %493 = vector.shape_cast %492 : vector<16x32xf32> to vector<1x16x32xf32>
    %cst_212 = arith.constant dense<0.000000e+00> : vector<1xf32>
    %494 = vector.multi_reduction <add>, %493, %cst_212 [1, 2] : vector<1x16x32xf32> to vector<1xf32>
    %495 = vector.shape_cast %494 : vector<1xf32> to vector<1x1x1xf32>
    %496 = vector.extract %495[0, 0, 0] : f32 from vector<1x1x1xf32>
    %497 = vector.shape_cast %491 : vector<16x32xf32> to vector<1x16x32xf32>
    %cst_213 = arith.constant dense<0.000000e+00> : vector<1xf32>
    %498 = vector.multi_reduction <add>, %497, %cst_213 [1, 2] : vector<1x16x32xf32> to vector<1xf32>
    %499 = vector.shape_cast %498 : vector<1xf32> to vector<1x1x1xf32>
    %500 = vector.extract %499[0, 0, 0] : f32 from vector<1x1x1xf32>
    %501 = arith.mulf %490, %34 : vector<16x32xf32>
    %502 = vector.shape_cast %501 : vector<16x32xf32> to vector<1x16x32xf32>
    %cst_214 = arith.constant dense<0.000000e+00> : vector<1xf32>
    %503 = vector.multi_reduction <add>, %502, %cst_214 [1, 2] : vector<1x16x32xf32> to vector<1xf32>
    %504 = vector.shape_cast %503 : vector<1xf32> to vector<1x1x1xf32>
    %505 = vector.extract %504[0, 0, 0] : f32 from vector<1x1x1xf32>
    %506 = vector.shape_cast %490 : vector<16x32xf32> to vector<1x16x32xf32>
    %cst_215 = arith.constant dense<0.000000e+00> : vector<1xf32>
    %507 = vector.multi_reduction <add>, %506, %cst_215 [1, 2] : vector<1x16x32xf32> to vector<1xf32>
    %508 = vector.shape_cast %507 : vector<1xf32> to vector<1x1x1xf32>
    %509 = vector.extract %508[0, 0, 0] : f32 from vector<1x1x1xf32>
    %510 = tpu.iota {dimensions = array<i32: 0>} : vector<8x128xi32>
    %c0_i32_216 = arith.constant 0 : i32
    %511 = vector.broadcast %c0_i32_216 : i32 to vector<8x128xi32>
    %512 = arith.cmpi eq, %510, %511 : vector<8x128xi32>
    %c1_i32_217 = arith.constant 1 : i32
    %513 = vector.broadcast %c1_i32_217 : i32 to vector<8x128xi32>
    %514 = arith.cmpi eq, %510, %513 : vector<8x128xi32>
    %c2_i32_218 = arith.constant 2 : i32
    %515 = vector.broadcast %c2_i32_218 : i32 to vector<8x128xi32>
    %516 = arith.cmpi eq, %510, %515 : vector<8x128xi32>
    %c3_i32_219 = arith.constant 3 : i32
    %517 = vector.broadcast %c3_i32_219 : i32 to vector<8x128xi32>
    %518 = arith.cmpi eq, %510, %517 : vector<8x128xi32>
    %cst_220 = arith.constant 0.000000e+00 : f32
    %519 = vector.broadcast %509 : f32 to vector<8x128xf32>
    %520 = vector.broadcast %cst_220 : f32 to vector<8x128xf32>
    %521 = arith.select %518, %519, %520 : vector<8x128xi1>, vector<8x128xf32>
    %522 = vector.broadcast %505 : f32 to vector<8x128xf32>
    %523 = arith.select %516, %522, %521 : vector<8x128xi1>, vector<8x128xf32>
    %524 = vector.broadcast %500 : f32 to vector<8x128xf32>
    %525 = arith.select %514, %524, %523 : vector<8x128xi1>, vector<8x128xf32>
    %526 = vector.broadcast %496 : f32 to vector<8x128xf32>
    %527 = arith.select %512, %526, %525 : vector<8x128xi1>, vector<8x128xf32>
    %c0_221 = arith.constant 0 : index
    %c0_222 = arith.constant 0 : index
    %c0_223 = arith.constant 0 : index
    %528 = vector.load %arg3[%c0_221, %c0_222, %c0_223] : memref<1x8x128xf32, #tpu.memory_space<vmem>>, vector<1x8x128xf32>
    %529 = vector.shape_cast %528 : vector<1x8x128xf32> to vector<8x128xf32>
    %530 = vector.shape_cast %527 : vector<8x128xf32> to vector<1x8x128xf32>
    tpu.vector_store %arg3[%c0_221, %c0_222, %c0_223], %530 {strides = array<i32>} : memref<1x8x128xf32, #tpu.memory_space<vmem>>, vector<1x8x128xf32>,
    return
  }
  func.func @transform_0(%arg0: i32) -> (i32, i32, i32) {
    %c0_i32 = arith.constant 0 : i32
    %c0_i32_0 = arith.constant 0 : i32
    %c0_i32_1 = arith.constant 0 : i32
    return %arg0, %c0_i32, %c0_i32_0 : i32, i32, i32
  }
  func.func @transform_1(%arg0: i32) -> (i32, i32, i32) {
    %c0_i32 = arith.constant 0 : i32
    %c0_i32_0 = arith.constant 0 : i32
    %c0_i32_1 = arith.constant 0 : i32
    return %arg0, %c0_i32, %c0_i32_0 : i32, i32, i32
  }
  func.func @transform_2(%arg0: i32) -> (i32, i32, i32) {
    %c0_i32 = arith.constant 0 : i32
    %c0_i32_0 = arith.constant 0 : i32
    %c0_i32_1 = arith.constant 0 : i32
    return %arg0, %c0_i32, %c0_i32_0 : i32, i32, i32
  }
}

</mosaic_0001>

<bundles_post_ra>
// kernel: tpu_custom_call.1
= control target key start
LH: loop header
LB: loop body
LE: loop exit
PB: predicated region body
PF: predicated region fallthrough
CT: control target
= control target key end

     0   :  { %7 = vsyncpa [#allocation3], 0  ;;  %s2577_s0 = inlined_call_operand.hbm [shape: f32[1,16,32], index: 0, kind: input, shape index: {}]   ;;  %s2578_s1 = inlined_call_operand.hbm [shape: s8[1,16,32], index: 1, kind: input, shape index: {}]   ;;  %s2579_s2 = inlined_call_operand.hbm [shape: f32[1,8,128], index: 2, kind: output, shape index: {}]  }
   0x1   :  { %8 = vsyncpa [#allocation6], 0 }
   0x2   :  { %9 = vsyncpa [#allocation4], 0  ;;  %s1478_s9 = smov [#allocation2]  }
   0x3   :  { %s15_s10 = sshll.u32 %s1478_s9, 4  ;;  %s16_s10 = int_to_ptr.vmem [resolvable:$true] %s15_s10 }
   0x4   :  { %s1420_s11 = scalar_lea.vmem %s16_s10, 256  ;;  %p1425_p1 = scmp.lt.s32.totalorder %s16_s10, %s16_s10 }
   0x5   :  { %p1421_p0 = scmp.ne.s32.totalorder %s16_s10, %s1420_s11  ;;  %p1426_p2 = scmp.lt.s32.totalorder %s1420_s11, %s1420_s11 }
   0x7   :  { %p1427_p3 = por %p1426_p2, %p1425_p1 }
   0x9   :  { %p1428_p4 = pnand %p1427_p3, %p1421_p0 }
   0xb   :  { %1431 = shalt.err (!%p1428_p4)
}
   0xc   :  { %s1479_s12 = smov 128   ;;  %s1480_s13 = smov 8  }
   0xd   :  { %21 = dma.hbm_to_vmem [thread:$0]  %s2577_s0, 256, %s16_s10, [#allocation3], %s1479_s12, %s1479_s12, %s1480_s13  }
   0xe   :  { %s1481_s16 = smov [#allocation5]  }
   0xf   :  { %s27_s17 = sshll.u32 %s1481_s16, 4  ;;  %s28_s17 = int_to_ptr.vmem [resolvable:$true] %s27_s17 }
  0x10   :  { %s1440_s18 = scalar_lea.vmem %s28_s17, 64  ;;  %p1445_p6 = scmp.lt.s32.totalorder %s28_s17, %s28_s17 }
  0x11   :  { %p1441_p5 = scmp.ne.s32.totalorder %s28_s17, %s1440_s18  ;;  %p1446_p7 = scmp.lt.s32.totalorder %s1440_s18, %s1440_s18 }
  0x13   :  { %p1447_p8 = por %p1446_p7, %p1445_p6 }
  0x15   :  { %p1448_p9 = pnand %p1447_p8, %p1441_p5 }
  0x17   :  { %1451 = shalt.err (!%p1448_p9)
}
  0x18   :  { %s1482_s19 = smov 32   ;;  %s1483_s20 = smov 2  }
  0x19   :  { %33 = dma.hbm_to_vmem [thread:$0]  %s2578_s1, 64, %s28_s17, [#allocation6], %s1482_s19, %s1482_s19, %s1483_s20  }
  0x1a   :  { %1472 = dma.done.wait [#allocation3], 256  }
  0x1b   :  { %1473 = vsyncadd [#allocation3], 4294967040 }
  0x1c   :  { %1474 = dma.done.wait [#allocation6], 64  }
  0x1d   :  { %1475 = vsyncadd [#allocation6], 4294967232  ;;  %v1379_v0 = vld [vmem:[#allocation5] sm:$0xf]   ;;  %v63_v5 = vld [vmem:[#allocation2] sm:$0xff]  ;;  %vm97_vm1 = vcmask 261120   ;;  %v40_v22 = vlaneseq }
  0x1e   :  { %v1380_v1 = vunpack.c.0.s8 %v1379_v0  ;;  %v1381_v2 = vunpack.c.1.s8 %v1379_v0  ;;  %vm77_vm0 = vcmp.gt.f32.partialorder %v63_v5, 0.0  ;;  %v64_v6 = vld [vmem:[#allocation2 + $0x8] sm:$0xff]  ;;  %v1484_v7 = vmov 0.0   ;;  %s1485_s0 = smov 64   ;;  %s1486_s1 = smov 65  }
  0x1f   :  { %v1376_v8 = vsel %vm77_vm0, 1.0, %v1484_v7  ;;  %vm78_vm2 = vcmp.gt.f32.partialorder %v64_v6, 0.0  ;;  %vm114_vm3 = vcmask 1048064   ;;  %s1487_s23 = smov 127   ;;  %v1545_v23 = vshrl.u32 %v40_v22, 7  ;;  %s1488_s24 = smov 96  }
  0x20   :  { %v1513_v3 = vcvt.s32.f32 %v1380_v1  ;;  %v1517_v4 = vcvt.s32.f32 %v1381_v2  ;;  %v1377_v11 = vsel %vm78_vm2, 1.0, %v1484_v7  ;;  %v44_v24 = vand.u32 127, %v40_v22  ;;  %s1489_s29 = smov [#allocation7]  }
  0x21   :  { %vm102_vm4 = vcmp.lt.s32.totalorder %v1545_v23, 1  ;;  %vm57_vm5 = vcmp.ge.s32.totalorder %v1545_v23, 1  ;;  %v1561_v33 = vadd.s32 8, %v1545_v23  ;;  %vm109_vm7 = vcmp.lt.s32.totalorder %v1545_v23, 7  ;;  %s1366_s30 = sshll.u32 %s1489_s29, 4  ;;  %s1367_s30 = int_to_ptr.vmem [resolvable:$true] %s1366_s30 }
  0x22   :  { %2585 = vst [vmem:[#allocation11_spill] sm:$0xff] %v1513_v3  ;;  %91 = vrot.lane.b32.xlu0 %v1513_v3, %s1482_s19  ;;  %2586 = vst [vmem:[#allocation12_spill] sm:$0xff] %v1517_v4  ;;  %v49_v26 = vand.u32 15, %v44_v24  ;;  %vm1350_vm10 = vcmp.eq.s32.totalorder %v1545_v23, 3  ;;  %vm1349_vm11 = vcmp.eq.s32.totalorder %v1545_v23, 2  ;;  %vm1348_vm12 = vcmp.eq.s32.totalorder %v1545_v23, 1  ;;  %p1457_p11 = scmp.lt.s32.totalorder %s1367_s30, %s1367_s30 }
  0x23   :  { %vm60_vm9 = vcmp.lt.s32.totalorder %v1561_v33, 15  ;;  %vm1347_vm13 = vcmp.eq.s32.totalorder %v1545_v23, 0  ;;  %s1452_s3 = scalar_lea.vmem %s1367_s30, 128 }
  0x24   :  { %vm1553_vm6 = vcmp.ge.s32.totalorder %v49_v26, 1  ;;  %vm1566_vm8 = vcmp.lt.s32.totalorder %v49_v26, 15  ;;  %p1453_p10 = scmp.ne.s32.totalorder %s1367_s30, %s1452_s3  ;;  %p1458_p12 = scmp.lt.s32.totalorder %s1452_s3, %s1452_s3 }
  0x26   :  { %93 = vrot.lane.b32.xlu0 %v1517_v4, %s1482_s19  ;;  %p1459_p13 = por %p1458_p12, %p1457_p11 }
  0x28   :  { %p1460_p0 = pnand %p1459_p13, %p1453_p10 }
  0x94   :  { %v92_v9 = vpop.permute.xlu0 %91 }
  0x95   :  { %v1522_v10 = vsel %vm97_vm1, %v1376_v8, %v92_v9 }
  0x96   :  { %115 = vrot.lane.b32.xlu1 %v1522_v10, %s1485_s0  ;;  %v100_v27 = vrot.slane %v1522_v10, 7  ;;  %v107_v36 = vrot.slane %v1522_v10, 1 }
  0x98   :  { %v94_v12 = vpop.permute.xlu0 %93 }
  0x99   :  { %v1527_v13 = vsel %vm97_vm1, %v1377_v11, %v94_v12 }
  0x9a   :  { %118 = vrot.lane.b32.xlu1 %v1527_v13, %s1485_s0  ;;  %v101_v25 = vrot.slane %v1527_v13, 7  ;;  %v108_v32 = vrot.slane %v1527_v13, 1 }
  0x9c   :  { %v104_v28 = vsel %vm102_vm4, %v101_v25, %v100_v27  ;;  %v103_v38 = vsel %vm102_vm4, %v100_v27, %v101_v25  ;;  %v111_v42 = vsel %vm109_vm7, %v108_v32, %v107_v36  ;;  %v110_v43 = vsel %vm109_vm7, %v107_v36, %v108_v32 }
  0x9d   :  { %v105_v30 = vsel %vm57_vm5, %v104_v28, 1e+30  ;;  %v146_v48 = vmin.f32 %v103_v38, %v1527_v13  ;;  %v113_v49 = vsel %vm60_vm9, %v111_v42, 1e+30 }
  0x9e   :  { %v145_v37 = vmin.f32 %v105_v30, %v1522_v10 }
  0x9f   :  { %v148_v54 = vmin.f32 %v146_v48, %v113_v49 }
  0xa0   :  { %v147_v46 = vmin.f32 %v145_v37, %v110_v43 }
 0x108   :  { %v116_v14 = vpop.permute.xlu1 %115 }
 0x109   :  { %v117_v15 = vsel %vm114_vm3, %v116_v14, %v1522_v10 }
 0x10a   :  { %121 = vrot.lane.b32.xlu0 %v117_v15, %s1485_s0 }
 0x10c   :  { %v119_v16 = vpop.permute.xlu1 %118 }
 0x10d   :  { %v120_v17 = vsel %vm114_vm3, %v119_v16, %v1527_v13 }
 0x10e   :  { %123 = vrot.lane.b32.xlu1 %v120_v17, %s1485_s0 }
 0x17c   :  { %v122_v18 = vpop.permute.xlu0 %121 }
 0x17d   :  { %v125_v19 = vsel %vm114_vm3, %v122_v18, %v1522_v10 }
 0x17e   :  { %129 = vrot.lane.b32.xlu0 %v125_v19, %s1486_s1 }
 0x180   :  { %v124_v20 = vpop.permute.xlu1 %123 }
 0x181   :  { %v126_v21 = vsel %vm114_vm3, %v124_v20, %v1527_v13 }
 0x182   :  { %137 = vrot.lane.b32.xlu0 %v125_v19, %s1487_s23  ;;  %131 = vrot.lane.b32.xlu1 %v126_v21, %s1486_s1 }
 0x186   :  { %139 = vrot.lane.b32.xlu1 %v126_v21, %s1487_s23 }
 0x1f0   :  { %v130_v31 = vpop.permute.xlu0 %129 }
 0x1f1   :  { %v135_v34 = vsel %vm1553_vm6, %v130_v31, 1e+30 }
 0x1f2   :  { %v149_v39 = vmin.f32 %v135_v34, %v1522_v10 }
 0x1f4   :  { %v138_v40 = vpop.permute.xlu0 %137  ;;  %v132_v41 = vpop.permute.xlu1 %131 }
 0x1f5   :  { %v143_v44 = vsel %vm1566_vm8, %v138_v40, 1e+30  ;;  %v136_v45 = vsel %vm1553_vm6, %v132_v41, 1e+30 }
 0x1f6   :  { %v151_v47 = vmin.f32 %v149_v39, %v143_v44  ;;  %v150_v51 = vmin.f32 %v136_v45, %v1527_v13 }
 0x1f8   :  { %v1587_v50 = vmin.f32 %v147_v46, %v151_v47  ;;  %v140_v52 = vpop.permute.xlu1 %139 }
 0x1f9   :  { %v144_v53 = vsel %vm1566_vm8, %v140_v52, 1e+30 }
 0x1fa   :  { %v152_v55 = vmin.f32 %v150_v51, %v144_v53  ;;  %213 = vrot.lane.b32.xlu0 %v1587_v50, %s1485_s0  ;;  %v155_v57 = vrot.slane %v1587_v50, 7  ;;  %v161_v59 = vrot.slane %v1587_v50, 1 }
 0x1fc   :  { %v1594_v56 = vmin.f32 %v148_v54, %v152_v55 }
 0x1fe   :  { %216 = vrot.lane.b32.xlu1 %v1594_v56, %s1485_s0  ;;  %v156_v58 = vrot.slane %v1594_v56, 7  ;;  %v162_v60 = vrot.slane %v1594_v56, 1 }
 0x200   :  { %v158_v61 = vsel %vm102_vm4, %v156_v58, %v155_v57  ;;  %v157_v62 = vsel %vm102_vm4, %v155_v57, %v156_v58  ;;  %v164_v63 = vsel %vm109_vm7, %v162_v60, %v161_v59  ;;  %v163_v6 = vsel %vm109_vm7, %v161_v59, %v162_v60 }
 0x201   :  { %v159_v0 = vsel %vm57_vm5, %v158_v61, -1e+30  ;;  %v166_v2 = vsel %vm60_vm9, %v164_v63, -1e+30  ;;  %v168_v5 = vmax.f32 %v157_v62, %v1594_v56  ;;  %v209_v19 = vsel %vm57_vm5, %v158_v61, 1e+30 }
 0x202   :  { %v167_v1 = vmax.f32 %v159_v0, %v1587_v50  ;;  %v243_v22 = vmin.f32 %v209_v19, %v1587_v50  ;;  %v244_v32 = vmin.f32 %v157_v62, %v1594_v56  ;;  %v212_v34 = vsel %vm60_vm9, %v164_v63, 1e+30 }
 0x203   :  { %v1618_v8 = vmax.f32 %v168_v5, %v166_v2 }
 0x204   :  { %v1616_v7 = vmax.f32 %v167_v1, %v163_v6  ;;  %v245_v30 = vmin.f32 %v243_v22, %v163_v6  ;;  %v246_v40 = vmin.f32 %v244_v32, %v212_v34 }
 0x26c   :  { %v214_v9 = vpop.permute.xlu0 %213 }
 0x26d   :  { %v215_v11 = vsel %vm114_vm3, %v214_v9, %v1587_v50 }
 0x26e   :  { %219 = vrot.lane.b32.xlu0 %v215_v11, %s1485_s0 }
 0x270   :  { %v217_v12 = vpop.permute.xlu1 %216 }
 0x271   :  { %v218_v14 = vsel %vm114_vm3, %v217_v12, %v1594_v56 }
 0x272   :  { %221 = vrot.lane.b32.xlu1 %v218_v14, %s1485_s0 }
 0x2e0   :  { %v220_v15 = vpop.permute.xlu0 %219 }
 0x2e1   :  { %v223_v16 = vsel %vm114_vm3, %v220_v15, %v1587_v50 }
 0x2e2   :  { %227 = vrot.lane.b32.xlu0 %v223_v16, %s1486_s1 }
 0x2e4   :  { %v222_v17 = vpop.permute.xlu1 %221 }
 0x2e5   :  { %v224_v18 = vsel %vm114_vm3, %v222_v17, %v1594_v56 }
 0x2e6   :  { %235 = vrot.lane.b32.xlu0 %v223_v16, %s1487_s23  ;;  %229 = vrot.lane.b32.xlu1 %v224_v18, %s1486_s1 }
 0x2ea   :  { %237 = vrot.lane.b32.xlu1 %v224_v18, %s1487_s23 }
 0x354   :  { %v228_v20 = vpop.permute.xlu0 %227 }
 0x355   :  { %v233_v21 = vsel %vm1553_vm6, %v228_v20, 1e+30 }
 0x356   :  { %v247_v24 = vmin.f32 %v233_v21, %v1587_v50 }
 0x358   :  { %v236_v25 = vpop.permute.xlu0 %235  ;;  %v230_v26 = vpop.permute.xlu1 %229 }
 0x359   :  { %v241_v27 = vsel %vm1566_vm8, %v236_v25, 1e+30  ;;  %v234_v28 = vsel %vm1553_vm6, %v230_v26, 1e+30 }
 0x35a   :  { %v249_v31 = vmin.f32 %v247_v24, %v241_v27  ;;  %v248_v37 = vmin.f32 %v234_v28, %v1594_v56 }
 0x35c   :  { %v1647_v36 = vmin.f32 %v245_v30, %v249_v31  ;;  %v238_v38 = vpop.permute.xlu1 %237 }
 0x35d   :  { %v242_v39 = vsel %vm1566_vm8, %v238_v38, 1e+30 }
 0x35e   :  { %v250_v41 = vmin.f32 %v248_v37, %v242_v39  ;;  %319 = vrot.lane.b32.xlu0 %v1647_v36, %s1485_s0  ;;  %v253_v43 = vrot.slane %v1647_v36, 7  ;;  %v259_v45 = vrot.slane %v1647_v36, 1 }
 0x360   :  { %v1654_v42 = vmin.f32 %v246_v40, %v250_v41 }
 0x362   :  { %322 = vrot.lane.b32.xlu1 %v1654_v42, %s1485_s0  ;;  %v254_v44 = vrot.slane %v1654_v42, 7  ;;  %v260_v46 = vrot.slane %v1654_v42, 1 }
 0x364   :  { %v256_v47 = vsel %vm102_vm4, %v254_v44, %v253_v43  ;;  %v255_v48 = vsel %vm102_vm4, %v253_v43, %v254_v44  ;;  %v262_v49 = vsel %vm109_vm7, %v260_v46, %v259_v45  ;;  %v261_v55 = vsel %vm109_vm7, %v259_v45, %v260_v46 }
 0x365   :  { %v257_v51 = vsel %vm57_vm5, %v256_v47, -1e+30  ;;  %v264_v53 = vsel %vm60_vm9, %v262_v49, -1e+30  ;;  %v266_v54 = vmax.f32 %v255_v48, %v1654_v42  ;;  %v315_v5 = vsel %vm57_vm5, %v256_v47, 1e+30 }
 0x366   :  { %v265_v52 = vmax.f32 %v257_v51, %v1647_v36  ;;  %v349_v11 = vmin.f32 %v315_v5, %v1647_v36  ;;  %v350_v20 = vmin.f32 %v255_v48, %v1654_v42  ;;  %v318_v21 = vsel %vm60_vm9, %v262_v49, 1e+30 }
 0x367   :  { %v1678_v58 = vmax.f32 %v266_v54, %v264_v53 }
 0x368   :  { %v1676_v57 = vmax.f32 %v265_v52, %v261_v55  ;;  %v351_v18 = vmin.f32 %v349_v11, %v261_v55  ;;  %v352_v27 = vmin.f32 %v350_v20, %v318_v21 }
 0x3d0   :  { %v320_v59 = vpop.permute.xlu0 %319 }
 0x3d1   :  { %v321_v60 = vsel %vm114_vm3, %v320_v59, %v1647_v36 }
 0x3d2   :  { %325 = vrot.lane.b32.xlu0 %v321_v60, %s1485_s0 }
 0x3d4   :  { %v323_v61 = vpop.permute.xlu1 %322 }
 0x3d5   :  { %v324_v62 = vsel %vm114_vm3, %v323_v61, %v1654_v42 }
 0x3d6   :  { %327 = vrot.lane.b32.xlu1 %v324_v62, %s1485_s0 }
 0x444   :  { %v326_v63 = vpop.permute.xlu0 %325 }
 0x445   :  { %v329_v0 = vsel %vm114_vm3, %v326_v63, %v1647_v36 }
 0x446   :  { %333 = vrot.lane.b32.xlu0 %v329_v0, %s1486_s1 }
 0x448   :  { %v328_v1 = vpop.permute.xlu1 %327 }
 0x449   :  { %v330_v2 = vsel %vm114_vm3, %v328_v1, %v1654_v42 }
 0x44a   :  { %341 = vrot.lane.b32.xlu0 %v329_v0, %s1487_s23  ;;  %335 = vrot.lane.b32.xlu1 %v330_v2, %s1486_s1 }
 0x44e   :  { %343 = vrot.lane.b32.xlu1 %v330_v2, %s1487_s23 }
 0x4b8   :  { %v334_v6 = vpop.permute.xlu0 %333 }
 0x4b9   :  { %v339_v9 = vsel %vm1553_vm6, %v334_v6, 1e+30 }
 0x4ba   :  { %v353_v12 = vmin.f32 %v339_v9, %v1647_v36 }
 0x4bc   :  { %v342_v14 = vpop.permute.xlu0 %341  ;;  %v336_v15 = vpop.permute.xlu1 %335 }
 0x4bd   :  { %v347_v16 = vsel %vm1566_vm8, %v342_v14, 1e+30  ;;  %v340_v17 = vsel %vm1553_vm6, %v336_v15, 1e+30 }
 0x4be   :  { %v355_v19 = vmin.f32 %v353_v12, %v347_v16  ;;  %v354_v24 = vmin.f32 %v340_v17, %v1654_v42 }
 0x4c0   :  { %v1707_v22 = vmin.f32 %v351_v18, %v355_v19  ;;  %v344_v25 = vpop.permute.xlu1 %343 }
 0x4c1   :  { %v348_v26 = vsel %vm1566_vm8, %v344_v25, 1e+30 }
 0x4c2   :  { %v356_v28 = vmin.f32 %v354_v24, %v348_v26  ;;  %425 = vrot.lane.b32.xlu0 %v1707_v22, %s1485_s0  ;;  %v359_v31 = vrot.slane %v1707_v22, 7  ;;  %v365_v34 = vrot.slane %v1707_v22, 1 }
 0x4c4   :  { %v1714_v30 = vmin.f32 %v352_v27, %v356_v28 }
 0x4c6   :  { %428 = vrot.lane.b32.xlu1 %v1714_v30, %s1485_s0  ;;  %v360_v32 = vrot.slane %v1714_v30, 7  ;;  %v366_v37 = vrot.slane %v1714_v30, 1 }
 0x4c8   :  { %v362_v38 = vsel %vm102_vm4, %v360_v32, %v359_v31  ;;  %v361_v39 = vsel %vm102_vm4, %v359_v31, %v360_v32  ;;  %v368_v40 = vsel %vm109_vm7, %v366_v37, %v365_v34  ;;  %v367_v46 = vsel %vm109_vm7, %v365_v34, %v366_v37 }
 0x4c9   :  { %v363_v41 = vsel %vm57_vm5, %v362_v38, -1e+30  ;;  %v370_v44 = vsel %vm60_vm9, %v368_v40, -1e+30  ;;  %v372_v45 = vmax.f32 %v361_v39, %v1714_v30  ;;  %v421_v61 = vsel %vm57_vm5, %v362_v38, 1e+30 }
 0x4ca   :  { %v371_v43 = vmax.f32 %v363_v41, %v1707_v22  ;;  %v455_v0 = vmin.f32 %v421_v61, %v1707_v22  ;;  %v456_v14 = vmin.f32 %v361_v39, %v1714_v30  ;;  %v424_v15 = vsel %vm60_vm9, %v368_v40, 1e+30 }
 0x4cb   :  { %v1738_v48 = vmax.f32 %v372_v45, %v370_v44 }
 0x4cc   :  { %v1736_v47 = vmax.f32 %v371_v43, %v367_v46  ;;  %v457_v11 = vmin.f32 %v455_v0, %v367_v46  ;;  %v458_v20 = vmin.f32 %v456_v14, %v424_v15 }
 0x534   :  { %v426_v49 = vpop.permute.xlu0 %425 }
 0x535   :  { %v427_v51 = vsel %vm114_vm3, %v426_v49, %v1707_v22 }
 0x536   :  { %431 = vrot.lane.b32.xlu0 %v427_v51, %s1485_s0 }
 0x538   :  { %v429_v52 = vpop.permute.xlu1 %428 }
 0x539   :  { %v430_v53 = vsel %vm114_vm3, %v429_v52, %v1714_v30 }
 0x53a   :  { %433 = vrot.lane.b32.xlu1 %v430_v53, %s1485_s0 }
 0x5a8   :  { %v432_v54 = vpop.permute.xlu0 %431 }
 0x5a9   :  { %v435_v55 = vsel %vm114_vm3, %v432_v54, %v1707_v22 }
 0x5aa   :  { %439 = vrot.lane.b32.xlu0 %v435_v55, %s1486_s1 }
 0x5ac   :  { %v434_v59 = vpop.permute.xlu1 %433 }
 0x5ad   :  { %v436_v60 = vsel %vm114_vm3, %v434_v59, %v1714_v30 }
 0x5ae   :  { %447 = vrot.lane.b32.xlu0 %v435_v55, %s1487_s23  ;;  %441 = vrot.lane.b32.xlu1 %v436_v60, %s1486_s1 }
 0x5b2   :  { %449 = vrot.lane.b32.xlu1 %v436_v60, %s1487_s23 }
 0x61c   :  { %v440_v62 = vpop.permute.xlu0 %439 }
 0x61d   :  { %v445_v63 = vsel %vm1553_vm6, %v440_v62, 1e+30 }
 0x61e   :  { %v459_v1 = vmin.f32 %v445_v63, %v1707_v22 }
 0x620   :  { %v448_v2 = vpop.permute.xlu0 %447  ;;  %v442_v5 = vpop.permute.xlu1 %441 }
 0x621   :  { %v453_v6 = vsel %vm1566_vm8, %v448_v2, 1e+30  ;;  %v446_v9 = vsel %vm1553_vm6, %v442_v5, 1e+30 }
 0x622   :  { %v461_v12 = vmin.f32 %v459_v1, %v453_v6  ;;  %v460_v17 = vmin.f32 %v446_v9, %v1714_v30 }
 0x624   :  { %v1767_v16 = vmin.f32 %v457_v11, %v461_v12  ;;  %v450_v18 = vpop.permute.xlu1 %449 }
 0x625   :  { %v454_v19 = vsel %vm1566_vm8, %v450_v18, 1e+30 }
 0x626   :  { %v462_v21 = vmin.f32 %v460_v17, %v454_v19  ;;  %531 = vrot.lane.b32.xlu0 %v1767_v16, %s1485_s0  ;;  %v465_v25 = vrot.slane %v1767_v16, 7  ;;  %v471_v27 = vrot.slane %v1767_v16, 1 }
 0x628   :  { %v1774_v24 = vmin.f32 %v458_v20, %v462_v21 }
 0x62a   :  { %534 = vrot.lane.b32.xlu1 %v1774_v24, %s1485_s0  ;;  %v466_v26 = vrot.slane %v1774_v24, 7  ;;  %v472_v28 = vrot.slane %v1774_v24, 1 }
 0x62c   :  { %v468_v31 = vsel %vm102_vm4, %v466_v26, %v465_v25  ;;  %v467_v32 = vsel %vm102_vm4, %v465_v25, %v466_v26  ;;  %v474_v34 = vsel %vm109_vm7, %v472_v28, %v471_v27  ;;  %v473_v41 = vsel %vm109_vm7, %v471_v27, %v472_v28 }
 0x62d   :  { %v469_v37 = vsel %vm57_vm5, %v468_v31, -1e+30  ;;  %v476_v39 = vsel %vm60_vm9, %v474_v34, -1e+30  ;;  %v478_v40 = vmax.f32 %v467_v32, %v1774_v24  ;;  %v527_v59 = vsel %vm57_vm5, %v468_v31, 1e+30 }
 0x62e   :  { %v477_v38 = vmax.f32 %v469_v37, %v1767_v16  ;;  %v561_v62 = vmin.f32 %v527_v59, %v1767_v16  ;;  %v562_v11 = vmin.f32 %v467_v32, %v1774_v24  ;;  %v530_v12 = vsel %vm60_vm9, %v474_v34, 1e+30 }
 0x62f   :  { %v1798_v44 = vmax.f32 %v478_v40, %v476_v39 }
 0x630   :  { %v1796_v43 = vmax.f32 %v477_v38, %v473_v41  ;;  %v563_v6 = vmin.f32 %v561_v62, %v473_v41  ;;  %v564_v19 = vmin.f32 %v562_v11, %v530_v12 }
 0x698   :  { %v532_v45 = vpop.permute.xlu0 %531 }
 0x699   :  { %v533_v46 = vsel %vm114_vm3, %v532_v45, %v1767_v16 }
 0x69a   :  { %537 = vrot.lane.b32.xlu0 %v533_v46, %s1485_s0 }
 0x69c   :  { %v535_v49 = vpop.permute.xlu1 %534 }
 0x69d   :  { %v536_v51 = vsel %vm114_vm3, %v535_v49, %v1774_v24 }
 0x69e   :  { %539 = vrot.lane.b32.xlu1 %v536_v51, %s1485_s0 }
 0x70c   :  { %v538_v52 = vpop.permute.xlu0 %537 }
 0x70d   :  { %v541_v53 = vsel %vm114_vm3, %v538_v52, %v1767_v16 }
 0x70e   :  { %545 = vrot.lane.b32.xlu0 %v541_v53, %s1486_s1 }
 0x710   :  { %v540_v54 = vpop.permute.xlu1 %539 }
 0x711   :  { %v542_v55 = vsel %vm114_vm3, %v540_v54, %v1774_v24 }
 0x712   :  { %553 = vrot.lane.b32.xlu0 %v541_v53, %s1487_s23  ;;  %547 = vrot.lane.b32.xlu1 %v542_v55, %s1486_s1 }
 0x716   :  { %555 = vrot.lane.b32.xlu1 %v542_v55, %s1487_s23 }
 0x780   :  { %v546_v60 = vpop.permute.xlu0 %545 }
 0x781   :  { %v551_v61 = vsel %vm1553_vm6, %v546_v60, 1e+30 }
 0x782   :  { %v565_v63 = vmin.f32 %v551_v61, %v1767_v16 }
 0x784   :  { %v554_v0 = vpop.permute.xlu0 %553  ;;  %v548_v1 = vpop.permute.xlu1 %547 }
 0x785   :  { %v559_v2 = vsel %vm1566_vm8, %v554_v0, 1e+30  ;;  %v552_v5 = vsel %vm1553_vm6, %v548_v1, 1e+30 }
 0x786   :  { %v567_v9 = vmin.f32 %v565_v63, %v559_v2  ;;  %v566_v15 = vmin.f32 %v552_v5, %v1774_v24 }
 0x788   :  { %v1827_v14 = vmin.f32 %v563_v6, %v567_v9  ;;  %v556_v17 = vpop.permute.xlu1 %555 }
 0x789   :  { %v560_v18 = vsel %vm1566_vm8, %v556_v17, 1e+30 }
 0x78a   :  { %v568_v20 = vmin.f32 %v566_v15, %v560_v18  ;;  %637 = vrot.lane.b32.xlu0 %v1827_v14, %s1485_s0  ;;  %v571_v25 = vrot.slane %v1827_v14, 7  ;;  %v577_v27 = vrot.slane %v1827_v14, 1 }
 0x78c   :  { %v1834_v21 = vmin.f32 %v564_v19, %v568_v20 }
 0x78e   :  { %640 = vrot.lane.b32.xlu1 %v1834_v21, %s1485_s0  ;;  %v572_v26 = vrot.slane %v1834_v21, 7  ;;  %v578_v28 = vrot.slane %v1834_v21, 1 }
 0x790   :  { %v574_v31 = vsel %vm102_vm4, %v572_v26, %v571_v25  ;;  %v573_v32 = vsel %vm102_vm4, %v571_v25, %v572_v26  ;;  %v580_v34 = vsel %vm109_vm7, %v578_v28, %v577_v27  ;;  %v579_v41 = vsel %vm109_vm7, %v577_v27, %v578_v28 }
 0x791   :  { %v575_v37 = vsel %vm57_vm5, %v574_v31, -1e+30  ;;  %v582_v39 = vsel %vm60_vm9, %v580_v34, -1e+30  ;;  %v584_v40 = vmax.f32 %v573_v32, %v1834_v21  ;;  %v633_v61 = vsel %vm57_vm5, %v574_v31, 1e+30 }
 0x792   :  { %v583_v38 = vmax.f32 %v575_v37, %v1827_v14  ;;  %v667_v0 = vmin.f32 %v633_v61, %v1827_v14  ;;  %v668_v15 = vmin.f32 %v573_v32, %v1834_v21  ;;  %v636_v17 = vsel %vm60_vm9, %v580_v34, 1e+30 }
 0x793   :  { %v1858_v46 = vmax.f32 %v584_v40, %v582_v39 }
 0x794   :  { %v1856_v45 = vmax.f32 %v583_v38, %v579_v41  ;;  %v669_v11 = vmin.f32 %v667_v0, %v579_v41  ;;  %v670_v26 = vmin.f32 %v668_v15, %v636_v17 }
 0x7fc   :  { %v638_v49 = vpop.permute.xlu0 %637 }
 0x7fd   :  { %v639_v51 = vsel %vm114_vm3, %v638_v49, %v1827_v14 }
 0x7fe   :  { %643 = vrot.lane.b32.xlu0 %v639_v51, %s1485_s0 }
 0x800   :  { %v641_v52 = vpop.permute.xlu1 %640 }
 0x801   :  { %v642_v53 = vsel %vm114_vm3, %v641_v52, %v1834_v21 }
 0x802   :  { %645 = vrot.lane.b32.xlu1 %v642_v53, %s1485_s0 }
 0x870   :  { %v644_v54 = vpop.permute.xlu0 %643 }
 0x871   :  { %v647_v55 = vsel %vm114_vm3, %v644_v54, %v1827_v14 }
 0x872   :  { %651 = vrot.lane.b32.xlu0 %v647_v55, %s1486_s1 }
 0x874   :  { %v646_v59 = vpop.permute.xlu1 %645 }
 0x875   :  { %v648_v60 = vsel %vm114_vm3, %v646_v59, %v1834_v21 }
 0x876   :  { %659 = vrot.lane.b32.xlu0 %v647_v55, %s1487_s23  ;;  %653 = vrot.lane.b32.xlu1 %v648_v60, %s1486_s1 }
 0x87a   :  { %661 = vrot.lane.b32.xlu1 %v648_v60, %s1487_s23 }
 0x8e4   :  { %v652_v62 = vpop.permute.xlu0 %651 }
 0x8e5   :  { %v657_v63 = vsel %vm1553_vm6, %v652_v62, 1e+30 }
 0x8e6   :  { %v671_v1 = vmin.f32 %v657_v63, %v1827_v14 }
 0x8e8   :  { %v660_v2 = vpop.permute.xlu0 %659  ;;  %v654_v5 = vpop.permute.xlu1 %653 }
 0x8e9   :  { %v665_v6 = vsel %vm1566_vm8, %v660_v2, 1e+30  ;;  %v658_v9 = vsel %vm1553_vm6, %v654_v5, 1e+30 }
 0x8ea   :  { %v673_v12 = vmin.f32 %v671_v1, %v665_v6  ;;  %v672_v19 = vmin.f32 %v658_v9, %v1834_v21 }
 0x8ec   :  { %v1887_v18 = vmin.f32 %v669_v11, %v673_v12  ;;  %v662_v20 = vpop.permute.xlu1 %661 }
 0x8ed   :  { %v666_v25 = vsel %vm1566_vm8, %v662_v20, 1e+30 }
 0x8ee   :  { %v674_v27 = vmin.f32 %v672_v19, %v666_v25  ;;  %743 = vrot.lane.b32.xlu0 %v1887_v18, %s1485_s0  ;;  %v677_v31 = vrot.slane %v1887_v18, 7  ;;  %v683_v34 = vrot.slane %v1887_v18, 1 }
 0x8f0   :  { %v1894_v28 = vmin.f32 %v670_v26, %v674_v27 }
 0x8f2   :  { %746 = vrot.lane.b32.xlu1 %v1894_v28, %s1485_s0  ;;  %v678_v32 = vrot.slane %v1894_v28, 7  ;;  %v684_v37 = vrot.slane %v1894_v28, 1 }
 0x8f4   :  { %v680_v38 = vsel %vm102_vm4, %v678_v32, %v677_v31  ;;  %v679_v39 = vsel %vm102_vm4, %v677_v31, %v678_v32  ;;  %v686_v40 = vsel %vm109_vm7, %v684_v37, %v683_v34  ;;  %v685_v53 = vsel %vm109_vm7, %v683_v34, %v684_v37 }
 0x8f5   :  { %v681_v41 = vsel %vm57_vm5, %v680_v38, -1e+30  ;;  %v688_v51 = vsel %vm60_vm9, %v686_v40, -1e+30  ;;  %v690_v52 = vmax.f32 %v679_v39, %v1894_v28  ;;  %v739_v5 = vsel %vm57_vm5, %v680_v38, 1e+30 }
 0x8f6   :  { %v689_v49 = vmax.f32 %v681_v41, %v1887_v18  ;;  %v773_v11 = vmin.f32 %v739_v5, %v1887_v18  ;;  %v774_v27 = vmin.f32 %v679_v39, %v1894_v28  ;;  %v742_v31 = vsel %vm60_vm9, %v686_v40, 1e+30 }
 0x8f7   :  { %v1918_v55 = vmax.f32 %v690_v52, %v688_v51 }
 0x8f8   :  { %v1916_v54 = vmax.f32 %v689_v49, %v685_v53  ;;  %v775_v25 = vmin.f32 %v773_v11, %v685_v53  ;;  %v776_v41 = vmin.f32 %v774_v27, %v742_v31 }
 0x960   :  { %v744_v59 = vpop.permute.xlu0 %743 }
 0x961   :  { %v745_v60 = vsel %vm114_vm3, %v744_v59, %v1887_v18 }
 0x962   :  { %749 = vrot.lane.b32.xlu0 %v745_v60, %s1485_s0 }
 0x964   :  { %v747_v61 = vpop.permute.xlu1 %746 }
 0x965   :  { %v748_v62 = vsel %vm114_vm3, %v747_v61, %v1894_v28 }
 0x966   :  { %751 = vrot.lane.b32.xlu1 %v748_v62, %s1485_s0 }
 0x9d4   :  { %v750_v63 = vpop.permute.xlu0 %749 }
 0x9d5   :  { %v753_v0 = vsel %vm114_vm3, %v750_v63, %v1887_v18 }
 0x9d6   :  { %757 = vrot.lane.b32.xlu0 %v753_v0, %s1486_s1 }
 0x9d8   :  { %v752_v1 = vpop.permute.xlu1 %751 }
 0x9d9   :  { %v754_v2 = vsel %vm114_vm3, %v752_v1, %v1894_v28 }
 0x9da   :  { %765 = vrot.lane.b32.xlu0 %v753_v0, %s1487_s23  ;;  %759 = vrot.lane.b32.xlu1 %v754_v2, %s1486_s1 }
 0x9de   :  { %767 = vrot.lane.b32.xlu1 %v754_v2, %s1487_s23 }
 0xa48   :  { %v758_v6 = vpop.permute.xlu0 %757 }
 0xa49   :  { %v763_v9 = vsel %vm1553_vm6, %v758_v6, 1e+30 }
 0xa4a   :  { %v777_v12 = vmin.f32 %v763_v9, %v1887_v18 }
 0xa4c   :  { %v766_v15 = vpop.permute.xlu0 %765  ;;  %v760_v17 = vpop.permute.xlu1 %759 }
 0xa4d   :  { %v771_v19 = vsel %vm1566_vm8, %v766_v15, 1e+30  ;;  %v764_v20 = vsel %vm1553_vm6, %v760_v17, 1e+30 }
 0xa4e   :  { %v779_v26 = vmin.f32 %v777_v12, %v771_v19  ;;  %v778_v34 = vmin.f32 %v764_v20, %v1894_v28 }
 0xa50   :  { %v1947_v32 = vmin.f32 %v775_v25, %v779_v26  ;;  %v768_v37 = vpop.permute.xlu1 %767 }
 0xa51   :  { %v772_v38 = vsel %vm1566_vm8, %v768_v37, 1e+30 }
 0xa52   :  { %v780_v49 = vmin.f32 %v778_v34, %v772_v38  ;;  %849 = vrot.lane.b32.xlu0 %v1947_v32, %s1485_s0  ;;  %v783_v39 = vrot.slane %v1947_v32, 7  ;;  %v789_v52 = vrot.slane %v1947_v32, 1 }
 0xa54   :  { %v1954_v51 = vmin.f32 %v776_v41, %v780_v49 }
 0xa56   :  { %852 = vrot.lane.b32.xlu1 %v1954_v51, %s1485_s0  ;;  %v784_v40 = vrot.slane %v1954_v51, 7  ;;  %v790_v53 = vrot.slane %v1954_v51, 1 }
 0xa58   :  { %v786_v59 = vsel %vm102_vm4, %v784_v40, %v783_v39  ;;  %v785_v60 = vsel %vm102_vm4, %v783_v39, %v784_v40  ;;  %v792_v61 = vsel %vm109_vm7, %v790_v53, %v789_v52  ;;  %v791_v2 = vsel %vm109_vm7, %v789_v52, %v790_v53 }
 0xa59   :  { %v787_v62 = vsel %vm57_vm5, %v786_v59, -1e+30  ;;  %v794_v0 = vsel %vm60_vm9, %v792_v61, -1e+30  ;;  %v796_v1 = vmax.f32 %v785_v60, %v1954_v51  ;;  %v845_v26 = vsel %vm57_vm5, %v786_v59, 1e+30 }
 0xa5a   :  { %v795_v63 = vmax.f32 %v787_v62, %v1947_v32  ;;  %v879_v34 = vmin.f32 %v845_v26, %v1947_v32  ;;  %v880_v53 = vmin.f32 %v785_v60, %v1954_v51  ;;  %v848_v59 = vsel %vm60_vm9, %v792_v61, 1e+30 }
 0xa5b   :  { %v1978_v6 = vmax.f32 %v796_v1, %v794_v0 }
 0xa5c   :  { %v1976_v5 = vmax.f32 %v795_v63, %v791_v2  ;;  %v881_v40 = vmin.f32 %v879_v34, %v791_v2 }
 0xac4   :  { %v850_v9 = vpop.permute.xlu0 %849 }
 0xac5   :  { %v851_v11 = vsel %vm114_vm3, %v850_v9, %v1947_v32  ;;  %v882_v9 = vmin.f32 %v880_v53, %v848_v59 }
 0xac6   :  { %855 = vrot.lane.b32.xlu0 %v851_v11, %s1485_s0 }
 0xac8   :  { %v853_v12 = vpop.permute.xlu1 %852 }
 0xac9   :  { %v854_v15 = vsel %vm114_vm3, %v853_v12, %v1954_v51 }
 0xaca   :  { %857 = vrot.lane.b32.xlu1 %v854_v15, %s1485_s0 }
 0xb38   :  { %v856_v17 = vpop.permute.xlu0 %855 }
 0xb39   :  { %v859_v19 = vsel %vm114_vm3, %v856_v17, %v1947_v32 }
 0xb3a   :  { %863 = vrot.lane.b32.xlu0 %v859_v19, %s1486_s1 }
 0xb3c   :  { %v858_v20 = vpop.permute.xlu1 %857 }
 0xb3d   :  { %v860_v25 = vsel %vm114_vm3, %v858_v20, %v1954_v51 }
 0xb3e   :  { %871 = vrot.lane.b32.xlu0 %v859_v19, %s1487_s23  ;;  %865 = vrot.lane.b32.xlu1 %v860_v25, %s1486_s1 }
 0xb42   :  { %873 = vrot.lane.b32.xlu1 %v860_v25, %s1487_s23 }
 0xbac   :  { %v864_v27 = vpop.permute.xlu0 %863 }
 0xbad   :  { %v869_v31 = vsel %vm1553_vm6, %v864_v27, 1e+30 }
 0xbae   :  { %v883_v37 = vmin.f32 %v869_v31, %v1947_v32 }
 0xbb0   :  { %v872_v38 = vpop.permute.xlu0 %871  ;;  %v866_v41 = vpop.permute.xlu1 %865 }
 0xbb1   :  { %v877_v49 = vsel %vm1566_vm8, %v872_v38, 1e+30  ;;  %v870_v39 = vsel %vm1553_vm6, %v866_v41, 1e+30 }
 0xbb2   :  { %v885_v52 = vmin.f32 %v883_v37, %v877_v49  ;;  %v884_v63 = vmin.f32 %v870_v39, %v1954_v51 }
 0xbb4   :  { %v2007_v62 = vmin.f32 %v881_v40, %v885_v52  ;;  %v874_v0 = vpop.permute.xlu1 %873 }
 0xbb5   :  { %v878_v1 = vsel %vm1566_vm8, %v874_v0, 1e+30 }
 0xbb6   :  { %v886_v11 = vmin.f32 %v884_v63, %v878_v1  ;;  %955 = vrot.lane.b32.xlu0 %v2007_v62, %s1485_s0  ;;  %v889_v60 = vrot.slane %v2007_v62, 7  ;;  %v895_v12 = vrot.slane %v2007_v62, 1 }
 0xbb8   :  { %v2014_v2 = vmin.f32 %v882_v9, %v886_v11 }
 0xbba   :  { %958 = vrot.lane.b32.xlu1 %v2014_v2, %s1485_s0  ;;  %v890_v61 = vrot.slane %v2014_v2, 7  ;;  %v896_v15 = vrot.slane %v2014_v2, 1 }
 0xbbc   :  { %v892_v17 = vsel %vm102_vm4, %v890_v61, %v889_v60  ;;  %v891_v19 = vsel %vm102_vm4, %v889_v60, %v890_v61  ;;  %v898_v20 = vsel %vm109_vm7, %v896_v15, %v895_v12  ;;  %v897_v34 = vsel %vm109_vm7, %v895_v12, %v896_v15 }
 0xbbd   :  { %v893_v25 = vsel %vm57_vm5, %v892_v17, -1e+30  ;;  %v900_v27 = vsel %vm60_vm9, %v898_v20, -1e+30  ;;  %v902_v31 = vmax.f32 %v891_v19, %v2014_v2  ;;  %v951_v0 = vsel %vm57_vm5, %v892_v17, 1e+30 }
 0xbbe   :  { %v901_v26 = vmax.f32 %v893_v25, %v2007_v62  ;;  %v985_v11 = vmin.f32 %v951_v0, %v2007_v62  ;;  %v986_v17 = vmin.f32 %v891_v19, %v2014_v2 }
 0xbbf   :  { %v2038_v38 = vmax.f32 %v902_v31, %v900_v27  ;;  %v954_v31 = vsel %vm60_vm9, %v898_v20, 1e+30 }
 0xbc0   :  { %v2036_v37 = vmax.f32 %v901_v26, %v897_v34  ;;  %v987_v26 = vmin.f32 %v985_v11, %v897_v34 }
 0xc28   :  { %v956_v41 = vpop.permute.xlu0 %955 }
 0xc29   :  { %v957_v49 = vsel %vm114_vm3, %v956_v41, %v2007_v62 }
 0xc2a   :  { %961 = vrot.lane.b32.xlu0 %v957_v49, %s1485_s0 }
 0xc2c   :  { %v959_v39 = vpop.permute.xlu1 %958 }
 0xc2d   :  { %v960_v40 = vsel %vm114_vm3, %v959_v39, %v2014_v2 }
 0xc2e   :  { %963 = vrot.lane.b32.xlu1 %v960_v40, %s1485_s0 }
 0xc9c   :  { %v962_v52 = vpop.permute.xlu0 %961 }
 0xc9d   :  { %v965_v53 = vsel %vm114_vm3, %v962_v52, %v2007_v62  ;;  %v988_v52 = vmin.f32 %v986_v17, %v954_v31 }
 0xc9e   :  { %969 = vrot.lane.b32.xlu0 %v965_v53, %s1486_s1 }
 0xca0   :  { %v964_v59 = vpop.permute.xlu1 %963 }
 0xca1   :  { %v966_v63 = vsel %vm114_vm3, %v964_v59, %v2014_v2 }
 0xca2   :  { %977 = vrot.lane.b32.xlu0 %v965_v53, %s1487_s23  ;;  %971 = vrot.lane.b32.xlu1 %v966_v63, %s1486_s1 }
 0xca6   :  { %979 = vrot.lane.b32.xlu1 %v966_v63, %s1487_s23 }
 0xd10   :  { %v970_v1 = vpop.permute.xlu0 %969 }
 0xd11   :  { %v975_v9 = vsel %vm1553_vm6, %v970_v1, 1e+30 }
 0xd12   :  { %v989_v60 = vmin.f32 %v975_v9, %v2007_v62 }
 0xd14   :  { %v978_v61 = vpop.permute.xlu0 %977  ;;  %v972_v12 = vpop.permute.xlu1 %971 }
 0xd15   :  { %v983_v15 = vsel %vm1566_vm8, %v978_v61, 1e+30  ;;  %v976_v25 = vsel %vm1553_vm6, %v972_v12, 1e+30 }
 0xd16   :  { %v991_v27 = vmin.f32 %v989_v60, %v983_v15  ;;  %v990_v49 = vmin.f32 %v976_v25, %v2014_v2 }
 0xd18   :  { %v2067_v41 = vmin.f32 %v987_v26, %v991_v27  ;;  %v980_v39 = vpop.permute.xlu1 %979 }
 0xd19   :  { %v984_v40 = vsel %vm1566_vm8, %v980_v39, 1e+30 }
 0xd1a   :  { %2591 = vst [vmem:[#allocation13_spill] sm:$0xff] %v2067_v41  ;;  %v992_v53 = vmin.f32 %v990_v49, %v984_v40  ;;  %1061 = vrot.lane.b32.xlu0 %v2067_v41, %s1485_s0  ;;  %v995_v19 = vrot.slane %v2067_v41, 7  ;;  %v1001_v59 = vrot.slane %v2067_v41, 1 }
 0xd1c   :  { %v2074_v34 = vmin.f32 %v988_v52, %v992_v53 }
 0xd1e   :  { %1064 = vrot.lane.b32.xlu1 %v2074_v34, %s1485_s0  ;;  %v996_v20 = vrot.slane %v2074_v34, 7  ;;  %v1002_v63 = vrot.slane %v2074_v34, 1 }
 0xd20   :  { %v998_v0 = vsel %vm102_vm4, %v996_v20, %v995_v19  ;;  %v997_v1 = vsel %vm102_vm4, %v995_v19, %v996_v20  ;;  %v1004_v9 = vsel %vm109_vm7, %v1002_v63, %v1001_v59  ;;  %v1003_v15 = vsel %vm109_vm7, %v1001_v59, %v1002_v63 }
 0xd21   :  { %v999_v11 = vsel %vm57_vm5, %v998_v0, -1e+30  ;;  %v1006_v61 = vsel %vm60_vm9, %v1004_v9, -1e+30  ;;  %v1008_v12 = vmax.f32 %v997_v1, %v2074_v34  ;;  %v1057_v19 = vsel %vm57_vm5, %v998_v0, 1e+30 }
 0xd22   :  { %v1007_v60 = vmax.f32 %v999_v11, %v2067_v41  ;;  %v1091_v63 = vmin.f32 %v1057_v19, %v2067_v41  ;;  %v1092_v0 = vmin.f32 %v997_v1, %v2074_v34 }
 0xd23   :  { %v2098_v26 = vmax.f32 %v1008_v12, %v1006_v61 }
 0xd24   :  { %v2096_v25 = vmax.f32 %v1007_v60, %v1003_v15 }
 0xd8c   :  { %v1062_v27 = vpop.permute.xlu0 %1061 }
 0xd8d   :  { %v1063_v17 = vsel %vm114_vm3, %v1062_v27, %v2067_v41 }
 0xd8e   :  { %1067 = vrot.lane.b32.xlu0 %v1063_v17, %s1485_s0  ;;  %v1093_v17 = vmin.f32 %v1091_v63, %v1003_v15 }
 0xd90   :  { %v1065_v31 = vpop.permute.xlu1 %1064 }
 0xd91   :  { %v1066_v49 = vsel %vm114_vm3, %v1065_v31, %v2074_v34 }
 0xd92   :  { %1069 = vrot.lane.b32.xlu1 %v1066_v49, %s1485_s0  ;;  %v1060_v49 = vsel %vm60_vm9, %v1004_v9, 1e+30 }
 0xd93   :  { %v1094_v19 = vmin.f32 %v1092_v0, %v1060_v49 }
 0xe00   :  { %v1068_v39 = vpop.permute.xlu0 %1067 }
 0xe01   :  { %v1071_v40 = vsel %vm114_vm3, %v1068_v39, %v2067_v41 }
 0xe02   :  { %1075 = vrot.lane.b32.xlu0 %v1071_v40, %s1486_s1 }
 0xe04   :  { %v1070_v52 = vpop.permute.xlu1 %1069 }
 0xe05   :  { %v1072_v53 = vsel %vm114_vm3, %v1070_v52, %v2074_v34 }
 0xe06   :  { %1083 = vrot.lane.b32.xlu0 %v1071_v40, %s1487_s23  ;;  %1077 = vrot.lane.b32.xlu1 %v1072_v53, %s1486_s1 }
 0xe0a   :  { %1085 = vrot.lane.b32.xlu1 %v1072_v53, %s1487_s23 }
 0xe74   :  { %v1076_v20 = vpop.permute.xlu0 %1075 }
 0xe75   :  { %v1081_v59 = vsel %vm1553_vm6, %v1076_v20, 1e+30 }
 0xe76   :  { %v1095_v11 = vmin.f32 %v1081_v59, %v2067_v41 }
 0xe78   :  { %v1084_v60 = vpop.permute.xlu0 %1083  ;;  %v1078_v61 = vpop.permute.xlu1 %1077 }
 0xe79   :  { %v1089_v12 = vsel %vm1566_vm8, %v1084_v60, 1e+30  ;;  %v1082_v27 = vsel %vm1553_vm6, %v1078_v61, 1e+30 }
 0xe7a   :  { %v1097_v31 = vmin.f32 %v1095_v11, %v1089_v12  ;;  %v1096_v40 = vmin.f32 %v1082_v27, %v2074_v34 }
 0xe7c   :  { %v2127_v39 = vmin.f32 %v1093_v17, %v1097_v31  ;;  %v1086_v52 = vpop.permute.xlu1 %1085 }
 0xe7d   :  { %v1090_v53 = vsel %vm1566_vm8, %v1086_v52, 1e+30 }
 0xe7e   :  { %2592 = vst [vmem:[#allocation14_spill] sm:$0xff] %v2127_v39  ;;  %v1098_v20 = vmin.f32 %v1096_v40, %v1090_v53  ;;  %1167 = vrot.lane.b32.xlu0 %v2127_v39, %s1485_s0  ;;  %v1101_v1 = vrot.slane %v2127_v39, 7  ;;  %v1107_v59 = vrot.slane %v2127_v39, 1 }
 0xe80   :  { %v2134_v15 = vmin.f32 %v1094_v19, %v1098_v20 }
 0xe82   :  { %2593 = vst [vmem:[#allocation15_spill] sm:$0xff] %v2134_v15  ;;  %1170 = vrot.lane.b32.xlu1 %v2134_v15, %s1485_s0  ;;  %v1102_v9 = vrot.slane %v2134_v15, 7  ;;  %v1108_v63 = vrot.slane %v2134_v15, 1 }
 0xe84   :  { %v1104_v11 = vsel %vm102_vm4, %v1102_v9, %v1101_v1  ;;  %v1103_v60 = vsel %vm102_vm4, %v1101_v1, %v1102_v9  ;;  %v1110_v61 = vsel %vm109_vm7, %v1108_v63, %v1107_v59  ;;  %v1109_v0 = vsel %vm109_vm7, %v1107_v59, %v1108_v63 }
 0xe85   :  { %v1163_v12 = vsel %vm57_vm5, %v1104_v11, 1e+30  ;;  %v1166_v17 = vsel %vm60_vm9, %v1110_v61, 1e+30  ;;  %v1198_v31 = vmin.f32 %v1103_v60, %v2134_v15 }
 0xe86   :  { %v1197_v27 = vmin.f32 %v1163_v12, %v2127_v39 }
 0xe87   :  { %v2158_v40 = vmin.f32 %v1198_v31, %v1166_v17  ;;  %v1105_v31 = vsel %vm57_vm5, %v1104_v11, -1e+30 }
 0xe88   :  { %v2156_v49 = vmin.f32 %v1197_v27, %v1109_v0 }
 0xef0   :  { %v1168_v52 = vpop.permute.xlu0 %1167 }
 0xef1   :  { %v1169_v53 = vsel %vm114_vm3, %v1168_v52, %v2127_v39 }
 0xef2   :  { %1173 = vrot.lane.b32.xlu0 %v1169_v53, %s1485_s0  ;;  %v1113_v53 = vmax.f32 %v1105_v31, %v2127_v39 }
 0xef4   :  { %v1171_v19 = vpop.permute.xlu1 %1170  ;;  %v2222_v11 = vmax.f32 %v1113_v53, %v1109_v0 }
 0xef5   :  { %v1172_v20 = vsel %vm114_vm3, %v1171_v19, %v2134_v15 }
 0xef6   :  { %171 = vrot.lane.b32.xlu0 %v1616_v7, %s1485_s0  ;;  %1175 = vrot.lane.b32.xlu1 %v1172_v20, %s1485_s0 }
 0xefa   :  { %269 = vrot.lane.b32.xlu0 %v1676_v57, %s1485_s0  ;;  %174 = vrot.lane.b32.xlu1 %v1618_v8, %s1485_s0 }
 0xefe   :  { %272 = vrot.lane.b32.xlu1 %v1678_v58, %s1485_s0 }
 0xf64   :  { %v1174_v1 = vpop.permute.xlu0 %1173 }
 0xf65   :  { %v1177_v9 = vsel %vm114_vm3, %v1174_v1, %v2127_v39 }
 0xf66   :  { %1181 = vrot.lane.b32.xlu0 %v1177_v9, %s1486_s1 }
 0xf68   :  { %v1176_v59 = vpop.permute.xlu1 %1175  ;;  %v172_v12 = vpop.permute.xlu0 %171 }
 0xf69   :  { %v1178_v63 = vsel %vm114_vm3, %v1176_v59, %v2134_v15  ;;  %v173_v17 = vsel %vm114_vm3, %v172_v12, %v1616_v7 }
 0xf6a   :  { %1189 = vrot.lane.b32.xlu0 %v1177_v9, %s1487_s23  ;;  %1183 = vrot.lane.b32.xlu1 %v1178_v63, %s1486_s1  ;;  %v1114_v9 = vmax.f32 %v1103_v60, %v2134_v15 }
 0xf6c   :  { %v175_v27 = vpop.permute.xlu1 %174  ;;  %v270_v52 = vpop.permute.xlu0 %269 }
 0xf6d   :  { %v271_v19 = vsel %vm114_vm3, %v270_v52, %v1676_v57  ;;  %v176_v20 = vsel %vm114_vm3, %v175_v27, %v1618_v8 }
 0xf6e   :  { %375 = vrot.lane.b32.xlu0 %v1736_v47, %s1485_s0  ;;  %1191 = vrot.lane.b32.xlu1 %v1178_v63, %s1487_s23  ;;  %v1112_v63 = vsel %vm60_vm9, %v1110_v61, -1e+30 }
 0xf6f   :  { %v2232_v12 = vmax.f32 %v1114_v9, %v1112_v63 }
 0xf70   :  { %v273_v1 = vpop.permute.xlu1 %272 }
 0xf71   :  { %v274_v59 = vsel %vm114_vm3, %v273_v1, %v1678_v58 }
 0xf72   :  { %481 = vrot.lane.b32.xlu0 %v1796_v43, %s1485_s0  ;;  %378 = vrot.lane.b32.xlu1 %v1738_v48, %s1485_s0 }
 0xf76   :  { %587 = vrot.lane.b32.xlu0 %v1856_v45, %s1485_s0  ;;  %484 = vrot.lane.b32.xlu1 %v1798_v44, %s1485_s0 }
 0xf7a   :  { %693 = vrot.lane.b32.xlu0 %v1916_v54, %s1485_s0  ;;  %590 = vrot.lane.b32.xlu1 %v1858_v46, %s1485_s0 }
 0xf7e   :  { %799 = vrot.lane.b32.xlu0 %v1976_v5, %s1485_s0  ;;  %696 = vrot.lane.b32.xlu1 %v1918_v55, %s1485_s0 }
 0xf82   :  { %905 = vrot.lane.b32.xlu0 %v2036_v37, %s1485_s0  ;;  %802 = vrot.lane.b32.xlu1 %v1978_v6, %s1485_s0 }
 0xf86   :  { %1011 = vrot.lane.b32.xlu0 %v2096_v25, %s1485_s0  ;;  %908 = vrot.lane.b32.xlu1 %v2038_v38, %s1485_s0 }
 0xf8a   :  { %177 = vrot.lane.b32.xlu0 %v173_v17, %s1485_s0  ;;  %1014 = vrot.lane.b32.xlu1 %v2098_v26, %s1485_s0 }
 0xf8e   :  { %275 = vrot.lane.b32.xlu0 %v271_v19, %s1485_s0  ;;  %179 = vrot.lane.b32.xlu1 %v176_v20, %s1485_s0 }
 0xf92   :  { %1117 = vrot.lane.b32.xlu0 %v2222_v11, %s1485_s0  ;;  %277 = vrot.lane.b32.xlu1 %v274_v59, %s1485_s0 }
 0xf96   :  { %1120 = vrot.lane.b32.xlu1 %v2232_v12, %s1485_s0 }
 0xfd8   :  { %v1182_v0 = vpop.permute.xlu0 %1181 }
 0xfd9   :  { %v1187_v60 = vsel %vm1553_vm6, %v1182_v0, 1e+30 }
 0xfda   :  { %v1201_v27 = vmin.f32 %v1187_v60, %v2127_v39 }
 0xfdc   :  { %v1190_v17 = vpop.permute.xlu0 %1189  ;;  %v1184_v31 = vpop.permute.xlu1 %1183 }
 0xfdd   :  { %v1195_v61 = vsel %vm1566_vm8, %v1190_v17, 1e+30  ;;  %v1188_v52 = vsel %vm1553_vm6, %v1184_v31, 1e+30 }
 0xfde   :  { %v1203_v53 = vmin.f32 %v1201_v27, %v1195_v61  ;;  %v1202_v19 = vmin.f32 %v1188_v52, %v2134_v15 }
 0xfe0   :  { %v376_v20 = vpop.permute.xlu0 %375  ;;  %v1192_v1 = vpop.permute.xlu1 %1191  ;;  %v1205_v63 = vmin.f32 %v2156_v49, %v1203_v53 }
 0xfe1   :  { %v377_v9 = vsel %vm114_vm3, %v376_v20, %v1736_v47  ;;  %v1196_v59 = vsel %vm1566_vm8, %v1192_v1, 1e+30 }
 0xfe2   :  { %v1204_v0 = vmin.f32 %v1202_v19, %v1196_v59  ;;  %381 = vrot.lane.b32.xlu0 %v377_v9, %s1485_s0  ;;  %v1207_v61 = vrot.slane %v1205_v63, 7  ;;  %v1213_v52 = vrot.slane %v1205_v63, 1 }
 0xfe4   :  { %v1206_v60 = vmin.f32 %v2158_v40, %v1204_v0  ;;  %v482_v17 = vpop.permute.xlu0 %481  ;;  %v379_v31 = vpop.permute.xlu1 %378 }
 0xfe5   :  { %v380_v27 = vsel %vm114_vm3, %v379_v31, %v1738_v48  ;;  %v483_v33 = vsel %vm114_vm3, %v482_v17, %v1796_v43 }
 0xfe6   :  { %v1208_v3 = vrot.slane %v1206_v60, 7  ;;  %v1214_v4 = vrot.slane %v1206_v60, 1  ;;  %383 = vrot.lane.b32.xlu1 %v380_v27, %s1485_s0 }
 0xfe8   :  { %v1209_v20 = vsel %vm102_vm4, %v1207_v61, %v1208_v3  ;;  %v588_v49 = vpop.permute.xlu0 %587  ;;  %v485_v53 = vpop.permute.xlu1 %484  ;;  %v1216_v19 = vsel %vm109_vm7, %v1214_v4, %v1213_v52  ;;  %v1210_v40 = vsel %vm102_vm4, %v1208_v3, %v1207_v61  ;;  %v1215_v1 = vsel %vm109_vm7, %v1213_v52, %v1214_v4 }
 0xfe9   :  { %v1220_v9 = vmax.f32 %v1209_v20, %v1206_v60  ;;  %v1218_v59 = vsel %vm60_vm9, %v1216_v19, -1e+30  ;;  %v1211_v0 = vsel %vm57_vm5, %v1210_v40, -1e+30  ;;  %v486_v3 = vsel %vm114_vm3, %v485_v53, %v1798_v44 }
 0xfea   :  { %v1219_v27 = vmax.f32 %v1211_v0, %v1205_v63  ;;  %v589_v52 = vsel %vm114_vm3, %v588_v49, %v1856_v45 }
 0xfeb   :  { %v2266_v31 = vmax.f32 %v1220_v9, %v1218_v59 }
 0xfec   :  { %v591_v39 = vpop.permute.xlu1 %590  ;;  %v694_v15 = vpop.permute.xlu0 %693  ;;  %v2270_v41 = vmax.f32 %v1219_v27, %v1215_v1 }
 0xfed   :  { %1226 = vrot.lane.b32.xlu1 %v2266_v31, %s1485_s0  ;;  %v592_v60 = vsel %vm114_vm3, %v591_v39, %v1858_v46  ;;  %v695_v17 = vsel %vm114_vm3, %v694_v15, %v1916_v54 }
 0xfee   :  { %1223 = vrot.lane.b32.xlu0 %v2270_v41, %s1485_s0 }
 0xff0   :  { %v697_v4 = vpop.permute.xlu1 %696  ;;  %v800_v63 = vpop.permute.xlu0 %799 }
 0xff1   :  { %489 = vrot.lane.b32.xlu1 %v486_v3, %s1485_s0  ;;  %v698_v20 = vsel %vm114_vm3, %v697_v4, %v1918_v55  ;;  %v801_v49 = vsel %vm114_vm3, %v800_v63, %v1976_v5 }
 0xff2   :  { %487 = vrot.lane.b32.xlu0 %v483_v33, %s1485_s0 }
 0xff4   :  { %v803_v61 = vpop.permute.xlu1 %802  ;;  %v906_v19 = vpop.permute.xlu0 %905 }
 0xff5   :  { %595 = vrot.lane.b32.xlu1 %v592_v60, %s1485_s0  ;;  %v804_v39 = vsel %vm114_vm3, %v803_v61, %v1978_v6  ;;  %v907_v15 = vsel %vm114_vm3, %v906_v19, %v2036_v37 }
 0xff6   :  { %593 = vrot.lane.b32.xlu0 %v589_v52, %s1485_s0 }
 0xff8   :  { %v909_v53 = vpop.permute.xlu1 %908  ;;  %v1012_v1 = vpop.permute.xlu0 %1011 }
 0xff9   :  { %701 = vrot.lane.b32.xlu1 %v698_v20, %s1485_s0  ;;  %v910_v9 = vsel %vm114_vm3, %v909_v53, %v2038_v38  ;;  %v1013_v3 = vsel %vm114_vm3, %v1012_v1, %v2096_v25 }
 0xffa   :  { %699 = vrot.lane.b32.xlu0 %v695_v17, %s1485_s0 }
 0xffc   :  { %v1015_v40 = vpop.permute.xlu1 %1014  ;;  %v178_v27 = vpop.permute.xlu0 %177 }
 0xffd   :  { %807 = vrot.lane.b32.xlu1 %v804_v39, %s1485_s0  ;;  %v1016_v0 = vsel %vm114_vm3, %v1015_v40, %v2098_v26  ;;  %v181_v63 = vsel %vm114_vm3, %v178_v27, %v1616_v7 }
 0xffe   :  { %805 = vrot.lane.b32.xlu0 %v801_v49, %s1485_s0 }
0x1000   :  { %v180_v59 = vpop.permute.xlu1 %179  ;;  %v276_v60 = vpop.permute.xlu0 %275 }
0x1001   :  { %913 = vrot.lane.b32.xlu1 %v910_v9, %s1485_s0  ;;  %v182_v4 = vsel %vm114_vm3, %v180_v59, %v1618_v8  ;;  %v279_v52 = vsel %vm114_vm3, %v276_v60, %v1676_v57 }
0x1002   :  { %911 = vrot.lane.b32.xlu0 %v907_v15, %s1485_s0 }
0x1004   :  { %v278_v33 = vpop.permute.xlu1 %277  ;;  %v1118_v53 = vpop.permute.xlu0 %1117 }
0x1005   :  { %1019 = vrot.lane.b32.xlu1 %v1016_v0, %s1485_s0  ;;  %v280_v61 = vsel %vm114_vm3, %v278_v33, %v1678_v58  ;;  %v1119_v17 = vsel %vm114_vm3, %v1118_v53, %v2222_v11 }
0x1006   :  { %1017 = vrot.lane.b32.xlu0 %v1013_v3, %s1485_s0 }
0x1008   :  { %v1121_v20 = vpop.permute.xlu1 %1120 }
0x1009   :  { %187 = vrot.lane.b32.xlu1 %v182_v4, %s1486_s1  ;;  %v1122_v19 = vsel %vm114_vm3, %v1121_v20, %v2232_v12 }
0x100a   :  { %185 = vrot.lane.b32.xlu0 %v181_v63, %s1486_s1 }
0x100d   :  { %285 = vrot.lane.b32.xlu1 %v280_v61, %s1486_s1 }
0x100e   :  { %283 = vrot.lane.b32.xlu0 %v279_v52, %s1486_s1 }
0x1011   :  { %195 = vrot.lane.b32.xlu1 %v182_v4, %s1487_s23 }
0x1012   :  { %193 = vrot.lane.b32.xlu0 %v181_v63, %s1487_s23 }
0x1015   :  { %293 = vrot.lane.b32.xlu1 %v280_v61, %s1487_s23 }
0x1016   :  { %291 = vrot.lane.b32.xlu0 %v279_v52, %s1487_s23 }
0x1019   :  { %1125 = vrot.lane.b32.xlu1 %v1122_v19, %s1485_s0 }
0x101a   :  { %1123 = vrot.lane.b32.xlu0 %v1119_v17, %s1485_s0 }
0x1054   :  { %v382_v39 = vpop.permute.xlu0 %381 }
0x1055   :  { %v385_v40 = vsel %vm114_vm3, %v382_v39, %v1736_v47 }
0x1056   :  { %389 = vrot.lane.b32.xlu0 %v385_v40, %s1486_s1 }
0x1058   :  { %v384_v49 = vpop.permute.xlu1 %383 }
0x1059   :  { %v386_v1 = vsel %vm114_vm3, %v384_v49, %v1738_v48 }
0x105a   :  { %397 = vrot.lane.b32.xlu0 %v385_v40, %s1487_s23  ;;  %391 = vrot.lane.b32.xlu1 %v386_v1, %s1486_s1 }
0x105e   :  { %399 = vrot.lane.b32.xlu1 %v386_v1, %s1487_s23 }
0x105f   :  { %v1227_v9 = vpop.permute.xlu1 %1226 }
0x1060   :  { %v1228_v15 = vsel %vm114_vm3, %v1227_v9, %v2266_v31  ;;  %v1224_v59 = vpop.permute.xlu0 %1223 }
0x1061   :  { %v1225_v0 = vsel %vm114_vm3, %v1224_v59, %v2270_v41 }
0x1062   :  { %1231 = vrot.lane.b32.xlu1 %v1228_v15, %s1485_s0  ;;  %1229 = vrot.lane.b32.xlu0 %v1225_v0, %s1485_s0 }
0x1063   :  { %v490_v27 = vpop.permute.xlu1 %489 }
0x1064   :  { %v492_v3 = vsel %vm114_vm3, %v490_v27, %v1798_v44  ;;  %v488_v4 = vpop.permute.xlu0 %487 }
0x1065   :  { %v491_v33 = vsel %vm114_vm3, %v488_v4, %v1796_v43 }
0x1066   :  { %497 = vrot.lane.b32.xlu1 %v492_v3, %s1486_s1  ;;  %495 = vrot.lane.b32.xlu0 %v491_v33, %s1486_s1 }
0x1067   :  { %v596_v63 = vpop.permute.xlu1 %595 }
0x1068   :  { %v594_v60 = vpop.permute.xlu0 %593  ;;  %v598_v52 = vsel %vm114_vm3, %v596_v63, %v1858_v46 }
0x1069   :  { %v597_v53 = vsel %vm114_vm3, %v594_v60, %v1856_v45 }
0x106a   :  { %505 = vrot.lane.b32.xlu1 %v492_v3, %s1487_s23  ;;  %503 = vrot.lane.b32.xlu0 %v491_v33, %s1487_s23 }
0x106b   :  { %v702_v61 = vpop.permute.xlu1 %701 }
0x106c   :  { %v700_v20 = vpop.permute.xlu0 %699  ;;  %v704_v40 = vsel %vm114_vm3, %v702_v61, %v1918_v55 }
0x106d   :  { %v703_v1 = vsel %vm114_vm3, %v700_v20, %v1916_v54 }
0x106e   :  { %603 = vrot.lane.b32.xlu1 %v598_v52, %s1486_s1  ;;  %601 = vrot.lane.b32.xlu0 %v597_v53, %s1486_s1 }
0x106f   :  { %v808_v19 = vpop.permute.xlu1 %807 }
0x1070   :  { %v806_v17 = vpop.permute.xlu0 %805  ;;  %v810_v0 = vsel %vm114_vm3, %v808_v19, %v1978_v6 }
0x1071   :  { %v809_v3 = vsel %vm114_vm3, %v806_v17, %v1976_v5 }
0x1072   :  { %611 = vrot.lane.b32.xlu1 %v598_v52, %s1487_s23  ;;  %609 = vrot.lane.b32.xlu0 %v597_v53, %s1487_s23 }
0x1073   :  { %v914_v39 = vpop.permute.xlu1 %913 }
0x1074   :  { %v912_v49 = vpop.permute.xlu0 %911  ;;  %v916_v19 = vsel %vm114_vm3, %v914_v39, %v2038_v38 }
0x1076   :  { %709 = vrot.lane.b32.xlu1 %v704_v40, %s1486_s1  ;;  %707 = vrot.lane.b32.xlu0 %v703_v1, %s1486_s1 }
0x1077   :  { %v1020_v9 = vpop.permute.xlu1 %1019 }
0x1078   :  { %v1018_v15 = vpop.permute.xlu0 %1017 }
0x107a   :  { %717 = vrot.lane.b32.xlu1 %v704_v40, %s1487_s23  ;;  %715 = vrot.lane.b32.xlu0 %v703_v1, %s1487_s23 }
0x107b   :  { %v188_v59 = vpop.permute.xlu1 %187 }
0x107c   :  { %v186_v27 = vpop.permute.xlu0 %185  ;;  %v192_v33 = vsel %vm1553_vm6, %v188_v59, -1e+30  ;;  %v915_v59 = vsel %vm114_vm3, %v912_v49, %v2036_v37 }
0x107d   :  { %v191_v60 = vsel %vm1553_vm6, %v186_v27, -1e+30  ;;  %v202_v61 = vmax.f32 %v192_v33, %v1618_v8 }
0x107e   :  { %815 = vrot.lane.b32.xlu1 %v810_v0, %s1486_s1  ;;  %813 = vrot.lane.b32.xlu0 %v809_v3, %s1486_s1  ;;  %v201_v17 = vmax.f32 %v191_v60, %v1616_v7 }
0x107f   :  { %v286_v4 = vpop.permute.xlu1 %285 }
0x1080   :  { %v284_v63 = vpop.permute.xlu0 %283  ;;  %v290_v20 = vsel %vm1553_vm6, %v286_v4, -1e+30 }
0x1081   :  { %v289_v8 = vsel %vm1553_vm6, %v284_v63, -1e+30  ;;  %v300_v27 = vmax.f32 %v290_v20, %v1678_v58  ;;  %v1022_v20 = vsel %vm114_vm3, %v1020_v9, %v2098_v26 }
0x1082   :  { %823 = vrot.lane.b32.xlu1 %v810_v0, %s1487_s23  ;;  %821 = vrot.lane.b32.xlu0 %v809_v3, %s1487_s23  ;;  %v299_v4 = vmax.f32 %v289_v8, %v1676_v57 }
0x1083   :  { %v196_v52 = vpop.permute.xlu1 %195 }
0x1084   :  { %v200_v53 = vsel %vm1566_vm8, %v196_v52, -1e+30  ;;  %v194_v1 = vpop.permute.xlu0 %193 }
0x1085   :  { %v204_v40 = vmax.f32 %v202_v61, %v200_v53  ;;  %v199_v0 = vsel %vm1566_vm8, %v194_v1, -1e+30 }
0x1086   :  { %921 = vrot.lane.b32.xlu1 %v916_v19, %s1486_s1  ;;  %v203_v3 = vmax.f32 %v201_v17, %v199_v0  ;;  %919 = vrot.lane.b32.xlu0 %v915_v59, %s1486_s1  ;;  %v1021_v17 = vsel %vm114_vm3, %v1018_v15, %v2096_v25 }
0x1087   :  { %v294_v39 = vpop.permute.xlu1 %293  ;;  %v206_v49 = vsub.f32 %v1527_v13, %v204_v40 }
0x1088   :  { %v298_v7 = vsel %vm1566_vm8, %v294_v39, -1e+30  ;;  %v292_v63 = vpop.permute.xlu0 %291  ;;  %v205_v58 = vsub.f32 %v1522_v10, %v203_v3 }
0x1089   :  { %v302_v33 = vmax.f32 %v300_v27, %v298_v7  ;;  %v297_v60 = vsel %vm1566_vm8, %v292_v63, -1e+30  ;;  %v208_v57 = vmax.f32 %v206_v49, 0.0  ;;  %v1410_v7 = vld [vmem:[#allocation2 + $0x8] sm:$0xff]  ;;  %v1411_v49 = vld [vmem:[#allocation2] sm:$0xff] }
0x108a   :  { %929 = vrot.lane.b32.xlu1 %v916_v19, %s1487_s23  ;;  %v301_v52 = vmax.f32 %v299_v4, %v297_v60  ;;  %927 = vrot.lane.b32.xlu0 %v915_v59, %s1487_s23  ;;  %v207_v19 = vmax.f32 %v205_v58, 0.0  ;;  %v66_v4 = vsub.f32 0.0, %v1410_v7 }
0x108b   :  { %v304_v61 = vsub.f32 %v1594_v56, %v302_v33  ;;  %v1126_v59 = vpop.permute.xlu1 %1125  ;;  %v65_v33 = vsub.f32 0.0, %v1411_v49 }
0x108c   :  { %v303_v13 = vsub.f32 %v1587_v50, %v301_v52  ;;  %v1124_v0 = vpop.permute.xlu0 %1123  ;;  %v1128_v15 = vsel %vm114_vm3, %v1126_v59, %v2232_v12  ;;  %v69_v63 = vmul.f32 1.442695, %v66_v4 }
0x108d   :  { %v306_v53 = vmax.f32 %v304_v61, 0.0  ;;  %v1127_v3 = vsel %vm114_vm3, %v1124_v0, %v2222_v11  ;;  %v67_v60 = vmul.f32 1.442695, %v65_v33 }
0x108e   :  { %1027 = vrot.lane.b32.xlu1 %v1022_v20, %s1486_s1  ;;  %v305_v10 = vmax.f32 %v303_v13, 0.0  ;;  %1025 = vrot.lane.b32.xlu0 %v1021_v17, %s1486_s1  ;;  %1402 = vpow2.f32 %v69_v63 }
0x108f   :  { %v308_v40 = vmul.f32 %v306_v53, %v208_v57  ;;  %1404 = vpow2.f32 %v67_v60 }
0x1090   :  { %v307_v1 = vmul.f32 %v305_v10, %v207_v19 }
0x1091   :  { %v310_v56 = vsub.f32 %v306_v53, %v308_v40 }
0x1092   :  { %1035 = vrot.lane.b32.xlu1 %v1022_v20, %s1487_s23  ;;  %v309_v8 = vsub.f32 %v305_v10, %v307_v1  ;;  %1033 = vrot.lane.b32.xlu0 %v1021_v17, %s1487_s23 }
0x1093   :  { %v312_v9 = vmax.f32 %v310_v56, 0.0 }
0x1094   :  { %v311_v50 = vmax.f32 %v309_v8, 0.0 }
0x1095   :  { %v2420_v27 = vadd.f32 %v312_v9, %v208_v57 }
0x1096   :  { %1133 = vrot.lane.b32.xlu1 %v1128_v15, %s1486_s1  ;;  %1131 = vrot.lane.b32.xlu0 %v1127_v3, %s1486_s1  ;;  %v2426_v39 = vadd.f32 %v311_v50, %v207_v19 }
0x109a   :  { %1141 = vrot.lane.b32.xlu1 %v1128_v15, %s1487_s23  ;;  %1139 = vrot.lane.b32.xlu0 %v1127_v3, %s1487_s23 }
0x109b   :  { %v1403_v58 = vpop.eup %1402 }
0x109c   :  { %v1405_v61 = vpop.eup %1404  ;;  %v72_v57 = vadd.f32 1.0, %v1403_v58 }
0x109d   :  { %v71_v53 = vadd.f32 1.0, %v1405_v61 }
0x109e   :  { %1406 = vrcp.f32 %v72_v57 }
0x109f   :  { %1408 = vrcp.f32 %v71_v53 }
0x10ab   :  { %v2455_v58 = vpop.eup %1406 }
0x10ac   :  { %v2458_v61 = vpop.eup %1408 }
0x10c8   :  { %v390_v52 = vpop.permute.xlu0 %389 }
0x10c9   :  { %v395_v20 = vsel %vm1553_vm6, %v390_v52, -1e+30 }
0x10ca   :  { %v405_v13 = vmax.f32 %v395_v20, %v1736_v47 }
0x10cc   :  { %v398_v17 = vpop.permute.xlu0 %397  ;;  %v392_v19 = vpop.permute.xlu1 %391 }
0x10cd   :  { %v403_v40 = vsel %vm1566_vm8, %v398_v17, -1e+30  ;;  %v396_v10 = vsel %vm1553_vm6, %v392_v19, -1e+30 }
0x10ce   :  { %v407_v56 = vmax.f32 %v405_v13, %v403_v40  ;;  %v406_v1 = vmax.f32 %v396_v10, %v1738_v48 }
0x10d0   :  { %v400_v59 = vpop.permute.xlu1 %399  ;;  %v409_v9 = vsub.f32 %v1647_v36, %v407_v56 }
0x10d1   :  { %v404_v8 = vsel %vm1566_vm8, %v400_v59, -1e+30 }
0x10d2   :  { %v408_v47 = vmax.f32 %v406_v1, %v404_v8  ;;  %v411_v15 = vmax.f32 %v409_v9, 0.0 }
0x10d4   :  { %v410_v0 = vsub.f32 %v1654_v42, %v408_v47  ;;  %v1232_v50 = vpop.permute.xlu1 %1231  ;;  %v1230_v3 = vpop.permute.xlu0 %1229  ;;  %v413_v33 = vmul.f32 %v411_v15, %v2426_v39 }
0x10d5   :  { %v1234_v7 = vsel %vm114_vm3, %v1232_v50, %v2266_v31  ;;  %v1233_v49 = vsel %vm114_vm3, %v1230_v3, %v2270_v41 }
0x10d6   :  { %v412_v4 = vmax.f32 %v410_v0, 0.0  ;;  %1239 = vrot.lane.b32.xlu1 %v1234_v7, %s1486_s1  ;;  %1237 = vrot.lane.b32.xlu0 %v1233_v49, %s1486_s1  ;;  %v415_v53 = vsub.f32 %v411_v15, %v413_v33 }
0x10d8   :  { %v414_v36 = vmul.f32 %v412_v4, %v2420_v27  ;;  %v498_v48 = vpop.permute.xlu1 %497  ;;  %v496_v42 = vpop.permute.xlu0 %495 }
0x10d9   :  { %v502_v63 = vsel %vm1553_vm6, %v498_v48, -1e+30  ;;  %v501_v60 = vsel %vm1553_vm6, %v496_v42, -1e+30 }
0x10da   :  { %1247 = vrot.lane.b32.xlu1 %v1234_v7, %s1487_s23  ;;  %1245 = vrot.lane.b32.xlu0 %v1233_v49, %s1487_s23  ;;  %v416_v52 = vsub.f32 %v412_v4, %v414_v36  ;;  %v512_v20 = vmax.f32 %v502_v63, %v1798_v44  ;;  %v511_v13 = vmax.f32 %v501_v60, %v1796_v43  ;;  %v417_v43 = vmax.f32 %v415_v53, 0.0 }
0x10dc   :  { %v506_v57 = vpop.permute.xlu1 %505  ;;  %v504_v17 = vpop.permute.xlu0 %503  ;;  %v418_v44 = vmax.f32 %v416_v52, 0.0  ;;  %v419_v3 = vadd.f32 %v417_v43, %v2426_v39 }
0x10dd   :  { %v510_v19 = vsel %vm1566_vm8, %v506_v57, -1e+30  ;;  %v509_v40 = vsel %vm1566_vm8, %v504_v17, -1e+30 }
0x10de   :  { %v514_v10 = vmax.f32 %v512_v20, %v510_v19  ;;  %1301 = vrot.lane.b32.xlu1 %v2455_v58, %s1482_s19  ;;  %v513_v56 = vmax.f32 %v511_v13, %v509_v40  ;;  %1299 = vrot.lane.b32.xlu0 %v2458_v61, %s1482_s19  ;;  %v420_v50 = vadd.f32 %v418_v44, %v2420_v27 }
0x10e0   :  { %v516_v1 = vsub.f32 %v1714_v30, %v514_v10  ;;  %v604_v59 = vpop.permute.xlu1 %603  ;;  %v515_v9 = vsub.f32 %v1707_v22, %v513_v56  ;;  %v602_v8 = vpop.permute.xlu0 %601 }
0x10e1   :  { %v608_v7 = vsel %vm1553_vm6, %v604_v59, -1e+30  ;;  %v607_v30 = vsel %vm1553_vm6, %v602_v8, -1e+30 }
0x10e2   :  { %v518_v47 = vmax.f32 %v516_v1, 0.0  ;;  %v517_v0 = vmax.f32 %v515_v9, 0.0  ;;  %v618_v48 = vmax.f32 %v608_v7, %v1858_v46  ;;  %v617_v33 = vmax.f32 %v607_v30, %v1856_v45 }
0x10e4   :  { %v612_v15 = vpop.permute.xlu1 %611  ;;  %v610_v4 = vpop.permute.xlu0 %609  ;;  %v520_v49 = vmul.f32 %v518_v47, %v420_v50  ;;  %v519_v36 = vmul.f32 %v517_v0, %v419_v3 }
0x10e5   :  { %v616_v22 = vsel %vm1566_vm8, %v612_v15, -1e+30  ;;  %v615_v27 = vsel %vm1566_vm8, %v610_v4, -1e+30 }
0x10e6   :  { %v522_v39 = vsub.f32 %v518_v47, %v520_v49  ;;  %v620_v42 = vmax.f32 %v618_v48, %v616_v22  ;;  %v521_v63 = vsub.f32 %v517_v0, %v519_v36  ;;  %v619_v60 = vmax.f32 %v617_v33, %v615_v27 }
0x10e8   :  { %v524_v52 = vmax.f32 %v522_v39, 0.0  ;;  %v622_v20 = vsub.f32 %v1774_v24, %v620_v42  ;;  %v710_v57 = vpop.permute.xlu1 %709  ;;  %v523_v53 = vmax.f32 %v521_v63, 0.0  ;;  %v621_v13 = vsub.f32 %v1767_v16, %v619_v60  ;;  %v708_v17 = vpop.permute.xlu0 %707 }
0x10e9   :  { %v714_v45 = vsel %vm1553_vm6, %v710_v57, -1e+30  ;;  %v713_v59 = vsel %vm1553_vm6, %v708_v17, -1e+30 }
0x10ea   :  { %v526_v19 = vadd.f32 %v524_v52, %v420_v50  ;;  %v624_v40 = vmax.f32 %v622_v20, 0.0  ;;  %v525_v46 = vadd.f32 %v523_v53, %v419_v3  ;;  %v623_v10 = vmax.f32 %v621_v13, 0.0 }
0x10eb   :  { %v724_v16 = vmax.f32 %v714_v45, %v1918_v55  ;;  %v723_v8 = vmax.f32 %v713_v59, %v1916_v54 }
0x10ec   :  { %v718_v56 = vpop.permute.xlu1 %717  ;;  %v716_v44 = vpop.permute.xlu0 %715  ;;  %v626_v1 = vmul.f32 %v624_v40, %v526_v19  ;;  %v625_v43 = vmul.f32 %v623_v10, %v525_v46 }
0x10ed   :  { %v722_v24 = vsel %vm1566_vm8, %v718_v56, -1e+30  ;;  %v721_v9 = vsel %vm1566_vm8, %v716_v44, -1e+30 }
0x10ee   :  { %v628_v47 = vsub.f32 %v624_v40, %v626_v1  ;;  %v726_v0 = vmax.f32 %v724_v16, %v722_v24  ;;  %v627_v50 = vsub.f32 %v623_v10, %v625_v43  ;;  %v725_v15 = vmax.f32 %v723_v8, %v721_v9 }
0x10f0   :  { %v630_v3 = vmax.f32 %v628_v47, 0.0  ;;  %v728_v7 = vsub.f32 %v1834_v21, %v726_v0  ;;  %v816_v4 = vpop.permute.xlu1 %815  ;;  %v629_v49 = vmax.f32 %v627_v50, 0.0  ;;  %v727_v30 = vsub.f32 %v1827_v14, %v725_v15  ;;  %v814_v36 = vpop.permute.xlu0 %813 }
0x10f1   :  { %v820_v54 = vsel %vm1553_vm6, %v816_v4, -1e+30  ;;  %v819_v63 = vsel %vm1553_vm6, %v814_v36, -1e+30 }
0x10f2   :  { %v632_v22 = vadd.f32 %v630_v3, %v526_v19  ;;  %v730_v48 = vmax.f32 %v728_v7, 0.0  ;;  %v631_v55 = vadd.f32 %v629_v49, %v525_v46  ;;  %v729_v27 = vmax.f32 %v727_v30, 0.0 }
0x10f3   :  { %v830_v14 = vmax.f32 %v820_v54, %v1978_v6  ;;  %v829_v20 = vmax.f32 %v819_v63, %v1976_v5 }
0x10f4   :  { %v824_v33 = vpop.permute.xlu1 %823  ;;  %v822_v39 = vpop.permute.xlu0 %821  ;;  %v732_v42 = vmul.f32 %v730_v48, %v632_v22  ;;  %v731_v60 = vmul.f32 %v729_v27, %v631_v55 }
0x10f5   :  { %v828_v21 = vsel %vm1566_vm8, %v824_v33, -1e+30  ;;  %v827_v52 = vsel %vm1566_vm8, %v822_v39, -1e+30 }
0x10f6   :  { %v734_v57 = vsub.f32 %v730_v48, %v732_v42  ;;  %v832_v53 = vmax.f32 %v830_v14, %v828_v21  ;;  %v733_v13 = vsub.f32 %v729_v27, %v731_v60  ;;  %v831_v17 = vmax.f32 %v829_v20, %v827_v52 }
0x10f8   :  { %v736_v19 = vmax.f32 %v734_v57, 0.0  ;;  %v834_v40 = vsub.f32 %v1894_v28, %v832_v53  ;;  %v922_v46 = vpop.permute.xlu1 %921  ;;  %v735_v10 = vmax.f32 %v733_v13, 0.0  ;;  %v833_v56 = vsub.f32 %v1887_v18, %v831_v17  ;;  %v920_v45 = vpop.permute.xlu0 %919 }
0x10f9   :  { %v926_v5 = vsel %vm1553_vm6, %v922_v46, -1e+30  ;;  %v925_v9 = vsel %vm1553_vm6, %v920_v45, -1e+30 }
0x10fa   :  { %v738_v44 = vadd.f32 %v736_v19, %v632_v22  ;;  %v836_v1 = vmax.f32 %v834_v40, 0.0  ;;  %v737_v6 = vadd.f32 %v735_v10, %v631_v55  ;;  %v835_v59 = vmax.f32 %v833_v56, 0.0 }
0x10fb   :  { %v936_v18 = vmax.f32 %v926_v5, %v2038_v38  ;;  %v935_v0 = vmax.f32 %v925_v9, %v2036_v37 }
0x10fc   :  { %v930_v43 = vpop.permute.xlu1 %929  ;;  %v928_v24 = vpop.permute.xlu0 %927  ;;  %v838_v16 = vmul.f32 %v836_v1, %v738_v44  ;;  %v837_v8 = vmul.f32 %v835_v59, %v737_v6 }
0x10fd   :  { %v934_v28 = vsel %vm1566_vm8, %v930_v43, -1e+30  ;;  %v933_v47 = vsel %vm1566_vm8, %v928_v24, -1e+30 }
0x10fe   :  { %v840_v50 = vsub.f32 %v836_v1, %v838_v16  ;;  %v938_v15 = vmax.f32 %v936_v18, %v934_v28  ;;  %v839_v3 = vsub.f32 %v835_v59, %v837_v8  ;;  %v937_v7 = vmax.f32 %v935_v0, %v933_v47 }
0x1100   :  { %v842_v4 = vmax.f32 %v840_v50, 0.0  ;;  %v940_v49 = vsub.f32 %v1954_v51, %v938_v15  ;;  %v1028_v30 = vpop.permute.xlu1 %1027  ;;  %v841_v36 = vmax.f32 %v839_v3, 0.0  ;;  %v939_v22 = vsub.f32 %v1947_v32, %v937_v7  ;;  %v1026_v48 = vpop.permute.xlu0 %1025  ;;  %v2594_v15 = vld [vmem:[#allocation13_spill] sm:$0xff] }
0x1101   :  { %v1032_v37 = vsel %vm1553_vm6, %v1028_v30, -1e+30  ;;  %v1031_v63 = vsel %vm1553_vm6, %v1026_v48, -1e+30 }
0x1102   :  { %v844_v55 = vadd.f32 %v842_v4, %v738_v44  ;;  %v942_v27 = vmax.f32 %v940_v49, 0.0  ;;  %v843_v38 = vadd.f32 %v841_v36, %v737_v6  ;;  %v941_v33 = vmax.f32 %v939_v22, 0.0 }
0x1103   :  { %v1042_v32 = vmax.f32 %v1032_v37, %v2098_v26  ;;  %v1041_v14 = vmax.f32 %v1031_v63, %v2096_v25 }
0x1104   :  { %v1036_v54 = vpop.permute.xlu1 %1035  ;;  %v1034_v39 = vpop.permute.xlu0 %1033  ;;  %v944_v42 = vmul.f32 %v942_v27, %v844_v55  ;;  %v943_v60 = vmul.f32 %v941_v33, %v843_v38 }
0x1105   :  { %v1040_v51 = vsel %vm1566_vm8, %v1036_v54, -1e+30  ;;  %v1039_v21 = vsel %vm1566_vm8, %v1034_v39, -1e+30 }
0x1106   :  { %v946_v52 = vsub.f32 %v942_v27, %v944_v42  ;;  %v1044_v20 = vmax.f32 %v1042_v32, %v1040_v51  ;;  %v945_v57 = vsub.f32 %v941_v33, %v943_v60  ;;  %v1043_v53 = vmax.f32 %v1041_v14, %v1039_v21  ;;  %v2595_v21 = vld [vmem:[#allocation15_spill] sm:$0xff]  ;;  %v2596_v14 = vld [vmem:[#allocation14_spill] sm:$0xff] }
0x1108   :  { %v948_v13 = vmax.f32 %v946_v52, 0.0  ;;  %v1046_v17 = vsub.f32 %v2014_v2, %v1044_v20  ;;  %v1134_v19 = vpop.permute.xlu1 %1133  ;;  %v947_v40 = vmax.f32 %v945_v57, 0.0  ;;  %v1045_v46 = vsub.f32 %v2007_v62, %v1043_v53  ;;  %v1132_v10 = vpop.permute.xlu0 %1131 }
0x1109   :  { %v1138_v25 = vsel %vm1553_vm6, %v1134_v19, -1e+30  ;;  %v1137_v43 = vsel %vm1553_vm6, %v1132_v10, -1e+30 }
0x110a   :  { %v950_v56 = vadd.f32 %v948_v13, %v844_v55  ;;  %v1048_v45 = vmax.f32 %v1046_v17, 0.0  ;;  %v949_v26 = vadd.f32 %v947_v40, %v843_v38  ;;  %v1047_v44 = vmax.f32 %v1045_v46, 0.0 }
0x110b   :  { %v1148_v62 = vmax.f32 %v1138_v25, %v2232_v12  ;;  %v1147_v16 = vmax.f32 %v1137_v43, %v2222_v11 }
0x110c   :  { %v1142_v1 = vpop.permute.xlu1 %1141  ;;  %v1140_v6 = vpop.permute.xlu0 %1139  ;;  %v1050_v59 = vmul.f32 %v1048_v45, %v950_v56  ;;  %v1049_v5 = vmul.f32 %v1047_v44, %v949_v26 }
0x110d   :  { %v1146_v2 = vsel %vm1566_vm8, %v1142_v1, -1e+30  ;;  %v1145_v24 = vsel %vm1566_vm8, %v1140_v6, -1e+30  ;;  %v2597_v6 = vld [vmem:[#allocation12_spill] sm:$0xff] }
0x110e   :  { %v1052_v9 = vsub.f32 %v1048_v45, %v1050_v59  ;;  %v1150_v8 = vmax.f32 %v1148_v62, %v1146_v2  ;;  %v1051_v28 = vsub.f32 %v1047_v44, %v1049_v5  ;;  %v1149_v18 = vmax.f32 %v1147_v16, %v1145_v24  ;;  %v2598_v5 = vld [vmem:[#allocation11_spill] sm:$0xff] }
0x1110   :  { %v1054_v47 = vmax.f32 %v1052_v9, 0.0  ;;  %v1152_v0 = vsub.f32 %v2074_v34, %v1150_v8  ;;  %v1053_v50 = vmax.f32 %v1051_v28, 0.0  ;;  %v1151_v3 = vsub.f32 %v2594_v15, %v1149_v18 }
0x1112   :  { %v1056_v7 = vadd.f32 %v1054_v47, %v950_v56  ;;  %v1154_v4 = vmax.f32 %v1152_v0, 0.0  ;;  %v1055_v49 = vadd.f32 %v1053_v50, %v949_v26  ;;  %v1153_v30 = vmax.f32 %v1151_v3, 0.0 }
0x1114   :  { %v1156_v12 = vmul.f32 %v1154_v4, %v1056_v7  ;;  %v1155_v36 = vmul.f32 %v1153_v30, %v1055_v49 }
0x1116   :  { %v1158_v55 = vsub.f32 %v1154_v4, %v1156_v12  ;;  %v1157_v38 = vsub.f32 %v1153_v30, %v1155_v36 }
0x1118   :  { %v1160_v42 = vmax.f32 %v1158_v55, 0.0  ;;  %v1159_v51 = vmax.f32 %v1157_v38, 0.0 }
0x111a   :  { %v1162_v20 = vadd.f32 %v1160_v42, %v1056_v7  ;;  %v1161_v57 = vadd.f32 %v1159_v51, %v1055_v49 }
0x1148   :  { %v1240_v22 = vpop.permute.xlu1 %1239  ;;  %v1238_v48 = vpop.permute.xlu0 %1237 }
0x1149   :  { %v1244_v11 = vsel %vm1553_vm6, %v1240_v22, -1e+30  ;;  %v1243_v27 = vsel %vm1553_vm6, %v1238_v48, -1e+30 }
0x114a   :  { %v1254_v34 = vmax.f32 %v1244_v11, %v2266_v31  ;;  %v1253_v54 = vmax.f32 %v1243_v27, %v2270_v41 }
0x114c   :  { %v1248_v33 = vpop.permute.xlu1 %1247  ;;  %v1246_v37 = vpop.permute.xlu0 %1245 }
0x114d   :  { %v1252_v39 = vsel %vm1566_vm8, %v1248_v33, -1e+30  ;;  %v1251_v63 = vsel %vm1566_vm8, %v1246_v37, -1e+30 }
0x114e   :  { %v1256_v60 = vmax.f32 %v1254_v34, %v1252_v39  ;;  %v1255_v32 = vmax.f32 %v1253_v54, %v1251_v63 }
0x1150   :  { %v1258_v29 = vsub.f32 %v2595_v21, %v1256_v60  ;;  %v1257_v52 = vsub.f32 %v2596_v14, %v1255_v32  ;;  %v1302_v10 = vpop.permute.xlu1 %1301  ;;  %v1300_v56 = vpop.permute.xlu0 %1299 }
0x1152   :  { %v1260_v31 = vmax.f32 %v1258_v29, 0.0  ;;  %v1259_v53 = vmax.f32 %v1257_v52, 0.0 }
0x1154   :  { %v1262_v41 = vmul.f32 %v1260_v31, %v1162_v20  ;;  %v1261_v13 = vmul.f32 %v1259_v53, %v1161_v57 }
0x1156   :  { %v1264_v17 = vsub.f32 %v1260_v31, %v1262_v41  ;;  %v1263_v19 = vsub.f32 %v1259_v53, %v1261_v13 }
0x1158   :  { %v1266_v40 = vmax.f32 %v1264_v17, 0.0  ;;  %v1265_v46 = vmax.f32 %v1263_v19, 0.0 }
0x115a   :  { %v1268_v35 = vadd.f32 %v1266_v40, %v1162_v20  ;;  %v1267_v45 = vadd.f32 %v1265_v46, %v1161_v57 }
0x115c   :  { %v1306_v26 = vmul.f32 %v1302_v10, %v1268_v35  ;;  %v1270_v44 = vmul.f32 %v2455_v58, %v1268_v35  ;;  %v1305_v1 = vmul.f32 %v1300_v56, %v1267_v45  ;;  %v1269_v25 = vmul.f32 %v2458_v61, %v1267_v45 }
0x115e   :  { %1311 = vrot.lane.b32.xlu1 %v1306_v26, %s1488_s24  ;;  %v1272_v59 = vmul.f32 %v1270_v44, %v2597_v6  ;;  %v1286_v43 = vsel %vm97_vm1, %v1270_v44, 0.0  ;;  %1309 = vrot.lane.b32.xlu0 %v1305_v1, %s1488_s24  ;;  %v1271_v2 = vmul.f32 %v1269_v25, %v2598_v5  ;;  %v1285_v62 = vsel %vm97_vm1, %v1269_v25, 0.0 }
0x115f   :  { %v1287_v16 = vadd.f32 %v1286_v43, %v1285_v62 }
0x1160   :  { %v1274_v24 = vsel %vm97_vm1, %v1272_v59, 0.0  ;;  %v1273_v9 = vsel %vm97_vm1, %v1271_v2, 0.0 }
0x1161   :  { %v1275_v58 = vadd.f32 %v1274_v24, %v1273_v9 }
0x1162   :  { %1331 = vrot.lane.b32.xlu1 %v1268_v35, %s1488_s24  ;;  %1329 = vrot.lane.b32.xlu0 %v1267_v45, %s1488_s24 }
0x1181   :  { %1276 = vadd.xlane.f32.xlu0 %v1275_v58 }
0x1186   :  { %1288 = vadd.xlane.f32.xlu1 %v1287_v16 }
0x11d0   :  { %v1312_v61 = vpop.permute.xlu1 %1311  ;;  %v1310_v28 = vpop.permute.xlu0 %1309 }
0x11d1   :  { %v1316_v8 = vsel %vm97_vm1, %v1312_v61, 0.0  ;;  %v1315_v18 = vsel %vm97_vm1, %v1310_v28, 0.0 }
0x11d2   :  { %v1317_v47 = vadd.f32 %v1316_v8, %v1315_v18 }
0x11d4   :  { %v1332_v0 = vpop.permute.xlu1 %1331  ;;  %v1330_v15 = vpop.permute.xlu0 %1329  ;;  %1318 = vadd.xlane.f32.xlu0 %v1317_v47 }
0x11d5   :  { %v1336_v50 = vsel %vm97_vm1, %v1332_v0, 0.0  ;;  %v1335_v3 = vsel %vm97_vm1, %v1330_v15, 0.0 }
0x11d6   :  { %v1337_v7 = vadd.f32 %v1336_v50, %v1335_v3 }
0x11d8   :  { %1338 = vadd.xlane.f32.xlu0 %v1337_v7 }
0x120a   :  { %v1277_v4 = vpop.xlane.xlu0 %1276 }
0x120b   :  { %v1278_v49 = vrot.slane %v1277_v4, 4 }
0x120d   :  { %v1279_v30 = vadd.f32 %v1278_v49, %v1277_v4 }
0x120f   :  { %v1289_v12 = vpop.xlane.xlu1 %1288  ;;  %v1280_v36 = vrot.slane %v1279_v30, 2 }
0x1210   :  { %v1290_v22 = vrot.slane %v1289_v12, 4 }
0x1211   :  { %v1281_v11 = vadd.f32 %v1280_v36, %v1279_v30 }
0x1212   :  { %v1291_v48 = vadd.f32 %v1290_v22, %v1289_v12 }
0x1213   :  { %v1282_v27 = vrot.slane %v1281_v11, 1 }
0x1214   :  { %v1292_v55 = vrot.slane %v1291_v48, 2 }
0x1215   :  { %v1283_v34 = vadd.f32 %v1282_v27, %v1281_v11 }
0x1216   :  { %v1293_v38 = vadd.f32 %v1292_v55, %v1291_v48 }
0x1217   :  { %1382 = vpush %v1283_v34 }
0x1218   :  { %v1294_v33 = vrot.slane %v1293_v38, 1 }
0x121a   :  { %v1295_v54 = vadd.f32 %v1294_v33, %v1293_v38 }
0x121c   :  { %1384 = vpush %v1295_v54 }
0x1248   :  { %s1383_s25 = spop %1382 }
0x1249   :  { %v1357_v40 = vstv %s1383_s25 }
0x124d   :  { %s1385_s26 = spop %1384 }
0x124e   :  { %v1355_v17 = vstv %s1385_s26 }
0x125d   :  { %v1319_v37 = vpop.xlane.xlu0 %1318 }
0x125e   :  { %v1320_v39 = vrot.slane %v1319_v37, 4 }
0x1260   :  { %v1321_v42 = vadd.f32 %v1320_v39, %v1319_v37 }
0x1261   :  { %v1339_v63 = vpop.xlane.xlu0 %1338 }
0x1262   :  { %v1322_v60 = vrot.slane %v1321_v42, 2  ;;  %v1340_v51 = vrot.slane %v1339_v63, 4 }
0x1264   :  { %v1341_v32 = vadd.f32 %v1340_v51, %v1339_v63  ;;  %v1323_v21 = vadd.f32 %v1322_v60, %v1321_v42 }
0x1266   :  { %v1342_v29 = vrot.slane %v1341_v32, 2  ;;  %v1324_v14 = vrot.slane %v1323_v21, 1 }
0x1268   :  { %v1343_v52 = vadd.f32 %v1342_v29, %v1341_v32  ;;  %v1325_v20 = vadd.f32 %v1324_v14, %v1323_v21 }
0x126a   :  { %1386 = vpush %v1325_v20  ;;  %v1344_v31 = vrot.slane %v1343_v52, 1 }
0x126c   :  { %v1345_v57 = vadd.f32 %v1344_v31, %v1343_v52 }
0x126e   :  { %1388 = vpush %v1345_v57 }
0x129b   :  { %s1387_s27 = spop %1386 }
0x129c   :  { %v1353_v41 = vstv %s1387_s27 }
0x129f   :  { %s1389_s28 = spop %1388 }
0x12a0   :  { %v1351_v53 = vstv %s1389_s28 }
0x12a1   :  { %v1352_v13 = vsel %vm1350_vm10, %v1351_v53, 0.0 }
0x12a2   :  { %v1354_v19 = vsel %vm1349_vm11, %v1353_v41, %v1352_v13 }
0x12a3   :  { %v1356_v46 = vsel %vm1348_vm12, %v1355_v17, %v1354_v19 }
0x12a4   :  { %v1358_v10 = vsel %vm1347_vm13, %v1357_v40, %v1356_v46 }
0x12a5   :  { %1359 = vst [vmem:[#allocation7] sm:$0xff] %v1358_v10 }
0x12a6   :  { %1463 = shalt.err (!%p1460_p0)
}
0x12a7   :  { %1369 = dma.vmem_to_hbm [thread:$0]  %s1367_s30, 128, %s2579_s2, [#allocation4]  }
0x12a8   :  { %1476 = dma.done.wait [#allocation4], 128  }
0x12a9   :  { %1477 = vsyncadd [#allocation4], 4294967168 }
0x12aa   :  { %1373 = vsyncpa [#allocation3], 1 }
0x12ab   :  { %1374 = vsyncpa [#allocation6], 1 }
0x12ac   :  { %1375 = vsyncpa [#allocation4], 1 }

</bundles_post_ra>
